<compile_context>
chip_gen: v7x
topology: tpu7x:2x2x1
jax: 0.10.0
libtpu: 0.0.40
codegen_flags: <defaults>
</compile_context>

<pallas_src>
import jax
import jax.numpy as jnp
from jax.experimental import pallas as pl
from jax.experimental.pallas import tpu as pltpu

F1, D, F2 = 4, 2, 8
FEAT, T_LEN = 8, 150          # feature_size, num_timesteps
W1_POOL = 37                  # 150 // 4
W2_POOL = 4                   # 37 // 8
NUM_CLASSES = 2
EPS = 1e-5

# column offsets inside the packed (8, 33) parameter slab
_C_W2 = 0            # renormed depthwise-over-height weights   (8, 8)
_C_A = 8             # fused conv1*BN1*BN2 temporal coeffs      (8, 3)
_C_B2 = 11           # fused bias after BN2                     (8, 1)
_C_W3 = 12           # separable depthwise temporal weights     (8, 3)
_C_W4 = 15           # pointwise conv * BN3 gamma               (8, 8)
_C_B3 = 23           # BN3 bias fold                            (8, 1)
_C_WC0 = 24          # classifier weights, class 0              (8, 4)
_C_WC1 = 28          # classifier weights, class 1              (8, 4)
_C_BC = 32           # classifier bias (rows 0,1 used)          (8, 1)
_N_VEC = 33


# ----------------------------------------------------------------------------
# Pallas kernel: forward pass for a tile of `bb` samples.
# ----------------------------------------------------------------------------
def _eegnet_kernel(x_ref, vecs_ref, mats_ref, out_ref):
    f32 = jnp.float32
    bb = x_ref.shape[0]

    x = x_ref[...]                                            # (bb, 8, 150)
    vecs = vecs_ref[...]                                      # (8, 33)
    mats = mats_ref[...]                                      # (150, 41)

    w2r = vecs[:, _C_W2:_C_W2 + FEAT]                         # (8, 8)
    a0 = vecs[:, _C_A + 0:_C_A + 1][None]                     # (1, 8, 1)
    a1 = vecs[:, _C_A + 1:_C_A + 2][None]
    a2 = vecs[:, _C_A + 2:_C_A + 3][None]
    bias2 = vecs[:, _C_B2:_C_B2 + 1][None]
    c30 = vecs[:, _C_W3 + 0:_C_W3 + 1][None]
    c31 = vecs[:, _C_W3 + 1:_C_W3 + 2][None]
    c32 = vecs[:, _C_W3 + 2:_C_W3 + 3][None]
    w4e = vecs[:, _C_W4:_C_W4 + F2]                           # (8, 8)
    b3f = vecs[:, _C_B3:_C_B3 + 1][None]
    wc0 = vecs[:, _C_WC0:_C_WC0 + W2_POOL][None]              # (1, 8, 4)
    wc1 = vecs[:, _C_WC1:_C_WC1 + W2_POOL][None]
    bc0 = vecs[0:1, _C_BC:_C_BC + 1]                          # (1, 1)
    bc1 = vecs[1:2, _C_BC:_C_BC + 1]

    p1 = mats[:, :W1_POOL]                                    # (150, 37)
    p2 = mats[:W1_POOL, W1_POOL:W1_POOL + W2_POOL]            # (37, 4)

    # firstConv(1x3,pad1)+BN1 and depthwiseConv(8x1)+BN2, algebraically fused:
    # contract over height first (batched 8x8 matmul), then combine the +-1
    # temporal shifts with per-channel coefficients folded with both BNs.
    w2b = jnp.broadcast_to(w2r[None], (bb, F1 * D, FEAT))
    u = jnp.einsum('boh,bht->bot', w2b, x, preferred_element_type=f32)  # (bb,8,150)
    zc = jnp.zeros((bb, F1 * D, 1), f32)
    up = jnp.concatenate([zc, u[:, :, :T_LEN - 1]], axis=2)   # value at t-1 (zero pad)
    un = jnp.concatenate([u[:, :, 1:], zc], axis=2)           # value at t+1 (zero pad)
    y2 = a0 * up + a1 * u + a2 * un + bias2
    y2 = jnp.where(y2 > 0, y2, jnp.exp(jnp.minimum(y2, 0.0)) - 1.0)     # ELU

    # AvgPool(1,4) as a lane-axis matmul -> (bb, 8, 37)
    y3 = jnp.dot(y2.reshape(bb * F1 * D, T_LEN), p1,
                 preferred_element_type=f32).reshape(bb, F1 * D, W1_POOL)

    # separableConv: depthwise 1x3 (pad 1, per-channel) then pointwise 1x1+BN3
    zc2 = jnp.zeros((bb, F1 * D, 1), f32)
    y3p = jnp.concatenate([zc2, y3[:, :, :W1_POOL - 1]], axis=2)
    y3n = jnp.concatenate([y3[:, :, 1:], zc2], axis=2)
    y4 = c30 * y3p + c31 * y3 + c32 * y3n                     # (bb, 8, 37)
    w4b = jnp.broadcast_to(w4e[None], (bb, F2, F1 * D))
    y5 = jnp.einsum('bfo,bot->bft', w4b, y4, preferred_element_type=f32) + b3f
    y5 = jnp.where(y5 > 0, y5, jnp.exp(jnp.minimum(y5, 0.0)) - 1.0)     # ELU

    # AvgPool(1,8) as a lane-axis matmul -> (bb, 8, 4)
    y6 = jnp.dot(y5.reshape(bb * F2, W1_POOL), p2,
                 preferred_element_type=f32).reshape(bb, F2, W2_POOL)

    # classifier (Linear 32 -> 2) + log_softmax, computed once per tile
    l0 = jnp.sum(jnp.sum(y6 * wc0, axis=2, keepdims=True),
                 axis=1, keepdims=True) + bc0                 # (bb, 1, 1)
    l1 = jnp.sum(jnp.sum(y6 * wc1, axis=2, keepdims=True),
                 axis=1, keepdims=True) + bc1
    logits = jnp.concatenate([l0, l1], axis=2)                # (bb, 1, 2)
    m = jnp.max(logits, axis=2, keepdims=True)
    z = logits - m
    out_ref[...] = z - jnp.log(jnp.sum(jnp.exp(z), axis=2, keepdims=True))


# ----------------------------------------------------------------------------
# Parameter preparation (plain JAX glue, runs once on the host).
# ----------------------------------------------------------------------------
def fold_bn(gamma, beta, mean, var, eps=EPS):
    g = gamma / jnp.sqrt(var + eps)
    return g, beta - mean * g


def renorm_rows(w, max_norm=1.0):
    # torch.renorm(p=2, dim=0, maxnorm=1) on the depthwise conv weight.
    n = jnp.sqrt(jnp.sum(w * w, axis=1))
    s = jnp.where(n > max_norm, max_norm / n, 1.0)
    return w * s[:, None]


def prepare_params(params):
    (w1, bn1, w2r, bn2, w3, w4, bn3, wc, bc) = params
    g1, b1f = fold_bn(*bn1)
    g2, b2f = fold_bn(*bn2)
    g3, b3f = fold_bn(*bn3)

    cidx = jnp.arange(F1 * D) // D                                 # o -> o // D
    # fused (conv1 * BN1 * BN2) temporal coefficients and bias (per output chan)
    amat = g2[:, None] * g1[cidx][:, None] * w1[cidx, :]           # (8, 3)
    bias2 = g2 * b1f[cidx] * jnp.sum(w2r, axis=1) + b2f            # (8,)
    w4e = w4 * g3[:, None]                                         # pointwise * BN3 gamma
    wcr = wc.reshape(NUM_CLASSES, F2, W2_POOL)                     # (2, 8, 4)
    bc_col = jnp.zeros((F2,), jnp.float32).at[:NUM_CLASSES].set(bc)

    vecs = jnp.concatenate(
        [w2r, amat, bias2[:, None], w3, w4e, b3f[:, None],
         wcr[0], wcr[1], bc_col[:, None]], axis=1).astype(jnp.float32)
    assert vecs.shape == (F1 * D, _N_VEC)

    p1 = jnp.concatenate(
        [jnp.kron(jnp.eye(W1_POOL, dtype=jnp.float32),
                  jnp.ones((4, 1), jnp.float32) / 4.0),
         jnp.zeros((T_LEN - 4 * W1_POOL, W1_POOL), jnp.float32)], axis=0)
    p2 = jnp.concatenate(
        [jnp.kron(jnp.eye(W2_POOL, dtype=jnp.float32),
                  jnp.ones((8, 1), jnp.float32) / 8.0),
         jnp.zeros((W1_POOL - 8 * W2_POOL, W2_POOL), jnp.float32)], axis=0)
    mats = jnp.zeros((T_LEN, W1_POOL + W2_POOL), jnp.float32)
    mats = mats.at[:, :W1_POOL].set(p1)
    mats = mats.at[:W1_POOL, W1_POOL:].set(p2)
    return vecs, mats


def _round_up(n, m):
    return ((n + m - 1) // m) * m


def eegnet150_forward(x, params, block_b=128):
    """x: (B, num_timesteps=150, feature_size=8)  ->  (B, 2) log-probabilities."""
    B = x.shape[0]
    vecs, mats = prepare_params(params)
    x_t = jnp.transpose(x, (0, 2, 1)).astype(jnp.float32)          # (B, 8, 150)

    bb = _round_up(min(block_b, B), 8)                             # samples per grid step
    b_pad = _round_up(B, bb)
    if b_pad != B:
        x_t = jnp.pad(x_t, ((0, b_pad - B), (0, 0), (0, 0)))

    out = pl.pallas_call(
        _eegnet_kernel,
        out_shape=jax.ShapeDtypeStruct((b_pad, 1, NUM_CLASSES), jnp.float32),
        grid=(b_pad // bb,),
        in_specs=[
            pl.BlockSpec((bb, FEAT, T_LEN), lambda i: (i, 0, 0)),
            pl.BlockSpec(vecs.shape, lambda i: (0, 0)),
            pl.BlockSpec(mats.shape, lambda i: (0, 0)),
        ],
        out_specs=pl.BlockSpec((bb, 1, NUM_CLASSES), lambda i: (i, 0, 0)),
        compiler_params=pltpu.CompilerParams(dimension_semantics=("parallel",)),
    )(x_t, vecs, mats)
    return out[:B, 0, :]


# ----------------------------------------------------------------------------
# Pure-JAX reference (mirrors the PyTorch forward directly).
# ----------------------------------------------------------------------------
def reference_forward(x, params):
    (w1, bn1, w2r, bn2, w3, w4, bn3, wc, bc) = params
    B = x.shape[0]
    xb = jnp.transpose(x, (0, 2, 1))                               # (B, 8, 150)

    xp = jnp.pad(xb, ((0, 0), (0, 0), (1, 1)))
    y1 = jnp.zeros((B, F1, FEAT, T_LEN), jnp.float32)
    for k in range(3):
        y1 = y1 + w1[:, k][None, :, None, None] * xp[:, None, :, k:k + T_LEN]
    g1, b1, m1, v1 = bn1
    y1 = (y1 - m1[None, :, None, None]) / jnp.sqrt(v1 + EPS)[None, :, None, None] \
         * g1[None, :, None, None] + b1[None, :, None, None]

    y1g = y1[:, jnp.arange(F1 * D) // D]                           # (B, 8, 8, 150)
    y2 = jnp.einsum('oh,bohw->bow', w2r, y1g)
    g2, b2, m2, v2 = bn2
    y2 = (y2 - m2[None, :, None]) / jnp.sqrt(v2 + EPS)[None, :, None] \
         * g2[None, :, None] + b2[None, :, None]
    y2 = jnp.where(y2 > 0, y2, jnp.expm1(jnp.minimum(y2, 0.0)))
    y3 = y2[:, :, :W1_POOL * 4].reshape(B, F1 * D, W1_POOL, 4).mean(-1)

    y3p = jnp.pad(y3, ((0, 0), (0, 0), (1, 1)))
    y4 = jnp.zeros((B, F1 * D, W1_POOL), jnp.float32)
    for k in range(3):
        y4 = y4 + w3[:, k][None, :, None] * y3p[:, :, k:k + W1_POOL]
    y5 = jnp.einsum('oc,bcw->bow', w4, y4)
    g3, b3, m3, v3 = bn3
    y5 = (y5 - m3[None, :, None]) / jnp.sqrt(v3 + EPS)[None, :, None] \
         * g3[None, :, None] + b3[None, :, None]
    y5 = jnp.where(y5 > 0, y5, jnp.expm1(jnp.minimum(y5, 0.0)))
    y6 = y5[:, :, :W2_POOL * 8].reshape(B, F2, W2_POOL, 8).mean(-1)

    flat = y6.reshape(B, F2 * W2_POOL)
    logits = flat @ wc.T + bc[None, :]
    return jax.nn.log_softmax(logits, axis=1)


# ----------------------------------------------------------------------------
if __name__ == "__main__":
    key = jax.random.PRNGKey(0)
    ks = jax.random.split(key, 11)
    B = 2

    x = jax.random.normal(ks[0], (B, T_LEN, FEAT), jnp.float32)

    w1 = 0.3 * jax.random.normal(ks[1], (F1, 3), jnp.float32)
    w2 = 0.6 * jax.random.normal(ks[2], (F1 * D, FEAT), jnp.float32)
    w3 = 0.3 * jax.random.normal(ks[3], (F2, 3), jnp.float32)
    w4 = 0.3 * jax.random.normal(ks[4], (F2, F1 * D), jnp.float32)
    wc = 0.3 * jax.random.normal(ks[5], (NUM_CLASSES, F2 * W2_POOL), jnp.float32)
    bc = 0.1 * jax.random.normal(ks[6], (NUM_CLASSES,), jnp.float32)

    def bn_params(k, n):
        k1, k2, k3, k4 = jax.random.split(k, 4)
        gamma = 1.0 + 0.1 * jax.random.normal(k1, (n,), jnp.float32)
        beta = 0.1 * jax.random.normal(k2, (n,), jnp.float32)
        mean = 0.1 * jax.random.normal(k3, (n,), jnp.float32)
        var = 0.5 + jax.random.uniform(k4, (n,), jnp.float32)
        return gamma, beta, mean, var

    bn1 = bn_params(ks[7], F1)
    bn2 = bn_params(ks[8], F1 * D)
    bn3 = bn_params(ks[9], F2)

    w2r = renorm_rows(w2, 1.0)          # Conv2dWithConstraint max_norm=1 renorm
    params = (w1, bn1, w2r, bn2, w3, w4, bn3, wc, bc)

    # small-batch check (single grid step)
    out = jax.block_until_ready(eegnet150_forward(x, params))
    assert out.shape == (B, NUM_CLASSES)
    ref = reference_forward(x, params)
    err = float(jnp.max(jnp.abs(out - ref)))
    if not err < 1e-4:
        raise AssertionError(f"kernel/reference mismatch (B=2): max abs err {err}")

    # multi-block grid + batch-padding path
    B2 = 50
    x2 = jax.random.normal(ks[10], (B2, T_LEN, FEAT), jnp.float32)
    out2 = jax.block_until_ready(eegnet150_forward(x2, params, block_b=16))
    ref2 = reference_forward(x2, params)
    err2 = float(jnp.max(jnp.abs(out2 - ref2)))
    if not err2 < 1e-4:
        raise AssertionError(f"kernel/reference mismatch (B=50): max abs err {err2}")

    print("KERNEL_OK")
</pallas_src>

<mosaic_0001>
module attributes {stable_mosaic.version = 11 : i64} {
  func.func @_eegnet_kernel(%arg0: i32, %arg1: memref<8x8x150xf32, #tpu.memory_space<vmem>>, %arg2: memref<8x33xf32, #tpu.memory_space<vmem>>, %arg3: memref<150x41xf32, #tpu.memory_space<vmem>>, %arg4: memref<8x1x2xf32, #tpu.memory_space<vmem>>) attributes {dimension_semantics = [#tpu.dimension_semantics<parallel>], iteration_bounds = array<i64: 1>, scalar_prefetch = 0 : i64, scratch_operands = 0 : i64, tpu.core_type = #tpu.core_type<tc>, window_params = [{transform_indices = @transform_0, window_bounds = array<i64: 8, 8, 150>}, {pipeline_mode = #tpu.pipeline_mode<synchronous>, transform_indices = @transform_1, window_bounds = array<i64: 8, 33>}, {pipeline_mode = #tpu.pipeline_mode<synchronous>, transform_indices = @transform_2, window_bounds = array<i64: 150, 41>}, {transform_indices = @transform_3, window_bounds = array<i64: 8, 1, 2>}]} {
    %c0 = arith.constant 0 : index
    %c0_0 = arith.constant 0 : index
    %c0_1 = arith.constant 0 : index
    %0 = vector.load %arg1[%c0, %c0_0, %c0_1] : memref<8x8x150xf32, #tpu.memory_space<vmem>>, vector<8x8x150xf32>
    %c0_2 = arith.constant 0 : index
    %c0_3 = arith.constant 0 : index
    %1 = vector.load %arg2[%c0_2, %c0_3] : memref<8x33xf32, #tpu.memory_space<vmem>>, vector<8x33xf32>
    %c0_4 = arith.constant 0 : index
    %c0_5 = arith.constant 0 : index
    %2 = vector.load %arg3[%c0_4, %c0_5] : memref<150x41xf32, #tpu.memory_space<vmem>>, vector<150x41xf32>
    %3 = vector.extract_strided_slice %1 {offsets = [0, 0], sizes = [8, 8], strides = [1, 1]} : vector<8x33xf32> to vector<8x8xf32>
    %4 = vector.extract_strided_slice %1 {offsets = [0, 8], sizes = [8, 1], strides = [1, 1]} : vector<8x33xf32> to vector<8x1xf32>
    %5 = vector.shape_cast %4 : vector<8x1xf32> to vector<1x8x1xf32>
    %6 = vector.extract_strided_slice %1 {offsets = [0, 9], sizes = [8, 1], strides = [1, 1]} : vector<8x33xf32> to vector<8x1xf32>
    %7 = vector.shape_cast %6 : vector<8x1xf32> to vector<1x8x1xf32>
    %8 = vector.extract_strided_slice %1 {offsets = [0, 10], sizes = [8, 1], strides = [1, 1]} : vector<8x33xf32> to vector<8x1xf32>
    %9 = vector.shape_cast %8 : vector<8x1xf32> to vector<1x8x1xf32>
    %10 = vector.extract_strided_slice %1 {offsets = [0, 11], sizes = [8, 1], strides = [1, 1]} : vector<8x33xf32> to vector<8x1xf32>
    %11 = vector.shape_cast %10 : vector<8x1xf32> to vector<1x8x1xf32>
    %12 = vector.extract_strided_slice %1 {offsets = [0, 12], sizes = [8, 1], strides = [1, 1]} : vector<8x33xf32> to vector<8x1xf32>
    %13 = vector.shape_cast %12 : vector<8x1xf32> to vector<1x8x1xf32>
    %14 = vector.extract_strided_slice %1 {offsets = [0, 13], sizes = [8, 1], strides = [1, 1]} : vector<8x33xf32> to vector<8x1xf32>
    %15 = vector.shape_cast %14 : vector<8x1xf32> to vector<1x8x1xf32>
    %16 = vector.extract_strided_slice %1 {offsets = [0, 14], sizes = [8, 1], strides = [1, 1]} : vector<8x33xf32> to vector<8x1xf32>
    %17 = vector.shape_cast %16 : vector<8x1xf32> to vector<1x8x1xf32>
    %18 = vector.extract_strided_slice %1 {offsets = [0, 15], sizes = [8, 8], strides = [1, 1]} : vector<8x33xf32> to vector<8x8xf32>
    %19 = vector.extract_strided_slice %1 {offsets = [0, 23], sizes = [8, 1], strides = [1, 1]} : vector<8x33xf32> to vector<8x1xf32>
    %20 = vector.shape_cast %19 : vector<8x1xf32> to vector<1x8x1xf32>
    %21 = vector.extract_strided_slice %1 {offsets = [0, 24], sizes = [8, 4], strides = [1, 1]} : vector<8x33xf32> to vector<8x4xf32>
    %22 = vector.shape_cast %21 : vector<8x4xf32> to vector<1x8x4xf32>
    %23 = vector.extract_strided_slice %1 {offsets = [0, 28], sizes = [8, 4], strides = [1, 1]} : vector<8x33xf32> to vector<8x4xf32>
    %24 = vector.shape_cast %23 : vector<8x4xf32> to vector<1x8x4xf32>
    %25 = vector.extract_strided_slice %1 {offsets = [0, 32], sizes = [1, 1], strides = [1, 1]} : vector<8x33xf32> to vector<1x1xf32>
    %26 = vector.extract_strided_slice %1 {offsets = [1, 32], sizes = [1, 1], strides = [1, 1]} : vector<8x33xf32> to vector<1x1xf32>
    %27 = vector.extract_strided_slice %2 {offsets = [0, 0], sizes = [150, 37], strides = [1, 1]} : vector<150x41xf32> to vector<150x37xf32>
    %28 = vector.extract_strided_slice %2 {offsets = [0, 37], sizes = [37, 4], strides = [1, 1]} : vector<150x41xf32> to vector<37x4xf32>
    %29 = vector.shape_cast %3 : vector<8x8xf32> to vector<1x8x8xf32>
    %30 = vector.shape_cast %29 : vector<1x8x8xf32> to vector<1x8x8xf32>
    %31 = vector.broadcast %30 : vector<1x8x8xf32> to vector<8x8x8xf32>
    "tpu.trace_start"() <{level = 10 : i32, message = "boh,bht->bot"}> : () -> ()
    %cst = arith.constant dense<0.000000e+00> : vector<8x8x150xf32>
    %32 = tpu.matmul %31, %0, %cst {dimension_numbers = #tpu.dot_dimension_numbers<[2], [1], [1], [2], [0, 0, 0, 1, 1, 2], [0], [0]>} : vector<8x8x8xf32>, vector<8x8x150xf32>, vector<8x8x150xf32> -> vector<8x8x150xf32>
    %cst_6 = arith.constant 0.000000e+00 : f32
    "tpu.trace_stop"() : () -> ()
    %33 = vector.broadcast %cst_6 : f32 to vector<8x8x1xf32>
    %34 = vector.extract_strided_slice %32 {offsets = [0, 0, 0], sizes = [8, 8, 149], strides = [1, 1, 1]} : vector<8x8x150xf32> to vector<8x8x149xf32>
    %35 = tpu.concatenate %33, %34 in 2 : vector<8x8x1xf32>, vector<8x8x149xf32> -> vector<8x8x150xf32>
    %36 = vector.extract_strided_slice %32 {offsets = [0, 0, 1], sizes = [8, 8, 149], strides = [1, 1, 1]} : vector<8x8x150xf32> to vector<8x8x149xf32>
    %37 = tpu.concatenate %36, %33 in 2 : vector<8x8x149xf32>, vector<8x8x1xf32> -> vector<8x8x150xf32>
    %38 = vector.broadcast %5 : vector<1x8x1xf32> to vector<8x8x150xf32>
    %39 = arith.mulf %38, %35 : vector<8x8x150xf32>
    %40 = vector.broadcast %7 : vector<1x8x1xf32> to vector<8x8x150xf32>
    %41 = arith.mulf %40, %32 : vector<8x8x150xf32>
    %42 = arith.addf %39, %41 : vector<8x8x150xf32>
    %43 = vector.broadcast %9 : vector<1x8x1xf32> to vector<8x8x150xf32>
    %44 = arith.mulf %43, %37 : vector<8x8x150xf32>
    %45 = arith.addf %42, %44 : vector<8x8x150xf32>
    %46 = vector.broadcast %11 : vector<1x8x1xf32> to vector<8x8x150xf32>
    %47 = arith.addf %45, %46 : vector<8x8x150xf32>
    %cst_7 = arith.constant 0.000000e+00 : f32
    %48 = vector.broadcast %cst_7 : f32 to vector<8x8x150xf32>
    %49 = arith.cmpf ogt, %47, %48 : vector<8x8x150xf32>
    %cst_8 = arith.constant 0.000000e+00 : f32
    %50 = vector.broadcast %cst_8 : f32 to vector<8x8x150xf32>
    %51 = arith.minimumf %47, %50 : vector<8x8x150xf32>
    %52 = math.exp %51 : vector<8x8x150xf32>
    %cst_9 = arith.constant 1.000000e+00 : f32
    %53 = vector.broadcast %cst_9 : f32 to vector<8x8x150xf32>
    %54 = arith.subf %52, %53 : vector<8x8x150xf32>
    %55 = arith.select %49, %47, %54 : vector<8x8x150xi1>, vector<8x8x150xf32>
    %56 = vector.shape_cast %55 : vector<8x8x150xf32> to vector<64x150xf32>
    %cst_10 = arith.constant dense<0.000000e+00> : vector<64x37xf32>
    %57 = tpu.matmul %56, %27, %cst_10 {dimension_numbers = #tpu.dot_dimension_numbers<[1], [0], [0], [1], [0, 0, 1, 1], [], []>} : vector<64x150xf32>, vector<150x37xf32>, vector<64x37xf32> -> vector<64x37xf32>
    %58 = vector.shape_cast %57 : vector<64x37xf32> to vector<8x8x37xf32>
    %cst_11 = arith.constant 0.000000e+00 : f32
    %59 = vector.broadcast %cst_11 : f32 to vector<8x8x1xf32>
    %60 = vector.extract_strided_slice %58 {offsets = [0, 0, 0], sizes = [8, 8, 36], strides = [1, 1, 1]} : vector<8x8x37xf32> to vector<8x8x36xf32>
    %61 = tpu.concatenate %59, %60 in 2 : vector<8x8x1xf32>, vector<8x8x36xf32> -> vector<8x8x37xf32>
    %62 = vector.extract_strided_slice %58 {offsets = [0, 0, 1], sizes = [8, 8, 36], strides = [1, 1, 1]} : vector<8x8x37xf32> to vector<8x8x36xf32>
    %63 = tpu.concatenate %62, %59 in 2 : vector<8x8x36xf32>, vector<8x8x1xf32> -> vector<8x8x37xf32>
    %64 = vector.broadcast %13 : vector<1x8x1xf32> to vector<8x8x37xf32>
    %65 = arith.mulf %64, %61 : vector<8x8x37xf32>
    %66 = vector.broadcast %15 : vector<1x8x1xf32> to vector<8x8x37xf32>
    %67 = arith.mulf %66, %58 : vector<8x8x37xf32>
    %68 = arith.addf %65, %67 : vector<8x8x37xf32>
    %69 = vector.broadcast %17 : vector<1x8x1xf32> to vector<8x8x37xf32>
    %70 = arith.mulf %69, %63 : vector<8x8x37xf32>
    %71 = arith.addf %68, %70 : vector<8x8x37xf32>
    %72 = vector.shape_cast %18 : vector<8x8xf32> to vector<1x8x8xf32>
    %73 = vector.shape_cast %72 : vector<1x8x8xf32> to vector<1x8x8xf32>
    %74 = vector.broadcast %73 : vector<1x8x8xf32> to vector<8x8x8xf32>
    "tpu.trace_start"() <{level = 10 : i32, message = "bfo,bot->bft"}> : () -> ()
    %cst_12 = arith.constant dense<0.000000e+00> : vector<8x8x37xf32>
    %75 = tpu.matmul %74, %71, %cst_12 {dimension_numbers = #tpu.dot_dimension_numbers<[2], [1], [1], [2], [0, 0, 0, 1, 1, 2], [0], [0]>} : vector<8x8x8xf32>, vector<8x8x37xf32>, vector<8x8x37xf32> -> vector<8x8x37xf32>
    "tpu.trace_stop"() : () -> ()
    %76 = vector.broadcast %20 : vector<1x8x1xf32> to vector<8x8x37xf32>
    %77 = arith.addf %75, %76 : vector<8x8x37xf32>
    %cst_13 = arith.constant 0.000000e+00 : f32
    %78 = vector.broadcast %cst_13 : f32 to vector<8x8x37xf32>
    %79 = arith.cmpf ogt, %77, %78 : vector<8x8x37xf32>
    %cst_14 = arith.constant 0.000000e+00 : f32
    %80 = vector.broadcast %cst_14 : f32 to vector<8x8x37xf32>
    %81 = arith.minimumf %77, %80 : vector<8x8x37xf32>
    %82 = math.exp %81 : vector<8x8x37xf32>
    %cst_15 = arith.constant 1.000000e+00 : f32
    %83 = vector.broadcast %cst_15 : f32 to vector<8x8x37xf32>
    %84 = arith.subf %82, %83 : vector<8x8x37xf32>
    %85 = arith.select %79, %77, %84 : vector<8x8x37xi1>, vector<8x8x37xf32>
    %86 = vector.shape_cast %85 : vector<8x8x37xf32> to vector<64x37xf32>
    %cst_16 = arith.constant dense<0.000000e+00> : vector<64x4xf32>
    %87 = tpu.matmul %86, %28, %cst_16 {dimension_numbers = #tpu.dot_dimension_numbers<[1], [0], [0], [1], [0, 0, 1, 1], [], []>} : vector<64x37xf32>, vector<37x4xf32>, vector<64x4xf32> -> vector<64x4xf32>
    %88 = vector.shape_cast %87 : vector<64x4xf32> to vector<8x8x4xf32>
    %89 = vector.broadcast %22 : vector<1x8x4xf32> to vector<8x8x4xf32>
    %90 = arith.mulf %88, %89 : vector<8x8x4xf32>
    %cst_17 = arith.constant dense<0.000000e+00> : vector<8x8xf32>
    %91 = vector.multi_reduction <add>, %90, %cst_17 [2] : vector<8x8x4xf32> to vector<8x8xf32>
    %92 = vector.shape_cast %91 : vector<8x8xf32> to vector<8x8x1xf32>
    %cst_18 = arith.constant dense<0.000000e+00> : vector<8x1xf32>
    %93 = vector.multi_reduction <add>, %92, %cst_18 [1] : vector<8x8x1xf32> to vector<8x1xf32>
    %94 = vector.shape_cast %93 : vector<8x1xf32> to vector<8x1x1xf32>
    %95 = vector.shape_cast %25 : vector<1x1xf32> to vector<1x1x1xf32>
    %96 = vector.broadcast %95 : vector<1x1x1xf32> to vector<8x1x1xf32>
    %97 = arith.addf %94, %96 : vector<8x1x1xf32>
    %98 = vector.broadcast %24 : vector<1x8x4xf32> to vector<8x8x4xf32>
    %99 = arith.mulf %88, %98 : vector<8x8x4xf32>
    %cst_19 = arith.constant dense<0.000000e+00> : vector<8x8xf32>
    %100 = vector.multi_reduction <add>, %99, %cst_19 [2] : vector<8x8x4xf32> to vector<8x8xf32>
    %101 = vector.shape_cast %100 : vector<8x8xf32> to vector<8x8x1xf32>
    %cst_20 = arith.constant dense<0.000000e+00> : vector<8x1xf32>
    %102 = vector.multi_reduction <add>, %101, %cst_20 [1] : vector<8x8x1xf32> to vector<8x1xf32>
    %103 = vector.shape_cast %102 : vector<8x1xf32> to vector<8x1x1xf32>
    %104 = vector.shape_cast %26 : vector<1x1xf32> to vector<1x1x1xf32>
    %105 = vector.broadcast %104 : vector<1x1x1xf32> to vector<8x1x1xf32>
    %106 = arith.addf %103, %105 : vector<8x1x1xf32>
    %107 = tpu.concatenate %97, %106 in 2 : vector<8x1x1xf32>, vector<8x1x1xf32> -> vector<8x1x2xf32>
    %cst_21 = arith.constant dense<0xFF800000> : vector<8x1xf32>
    %108 = vector.multi_reduction <maximumf>, %107, %cst_21 [2] : vector<8x1x2xf32> to vector<8x1xf32>
    %109 = vector.shape_cast %108 : vector<8x1xf32> to vector<8x1x1xf32>
    %110 = vector.broadcast %109 : vector<8x1x1xf32> to vector<8x1x2xf32>
    %111 = arith.subf %107, %110 : vector<8x1x2xf32>
    %112 = math.exp %111 : vector<8x1x2xf32>
    %cst_22 = arith.constant dense<0.000000e+00> : vector<8x1xf32>
    %113 = vector.multi_reduction <add>, %112, %cst_22 [2] : vector<8x1x2xf32> to vector<8x1xf32>
    %114 = vector.shape_cast %113 : vector<8x1xf32> to vector<8x1x1xf32>
    %115 = math.log %114 : vector<8x1x1xf32>
    %116 = vector.broadcast %115 : vector<8x1x1xf32> to vector<8x1x2xf32>
    %117 = arith.subf %111, %116 : vector<8x1x2xf32>
    %c0_23 = arith.constant 0 : index
    %c0_24 = arith.constant 0 : index
    %c0_25 = arith.constant 0 : index
    %118 = vector.load %arg4[%c0_23, %c0_24, %c0_25] : memref<8x1x2xf32, #tpu.memory_space<vmem>>, vector<8x1x2xf32>
    tpu.vector_store %arg4[%c0_23, %c0_24, %c0_25], %117 {strides = array<i32>} : memref<8x1x2xf32, #tpu.memory_space<vmem>>, vector<8x1x2xf32>,
    return
  }
  func.func @transform_0(%arg0: i32) -> (i32, i32, i32) {
    %c0_i32 = arith.constant 0 : i32
    %c0_i32_0 = arith.constant 0 : i32
    %c0_i32_1 = arith.constant 0 : i32
    return %arg0, %c0_i32, %c0_i32_0 : i32, i32, i32
  }
  func.func @transform_1(%arg0: i32) -> (i32, i32) {
    %c0_i32 = arith.constant 0 : i32
    %c0_i32_0 = arith.constant 0 : i32
    %c0_i32_1 = arith.constant 0 : i32
    return %c0_i32, %c0_i32_0 : i32, i32
  }
  func.func @transform_2(%arg0: i32) -> (i32, i32) {
    %c0_i32 = arith.constant 0 : i32
    %c0_i32_0 = arith.constant 0 : i32
    %c0_i32_1 = arith.constant 0 : i32
    return %c0_i32, %c0_i32_0 : i32, i32
  }
  func.func @transform_3(%arg0: i32) -> (i32, i32, i32) {
    %c0_i32 = arith.constant 0 : i32
    %c0_i32_0 = arith.constant 0 : i32
    %c0_i32_1 = arith.constant 0 : i32
    return %arg0, %c0_i32, %c0_i32_0 : i32, i32, i32
  }
}

</mosaic_0001>

<bundles_post_ra>
// kernel: tpu_custom_call.1
= control target key start
LH: loop header
LB: loop body
LE: loop exit
PB: predicated region body
PF: predicated region fallthrough
CT: control target
= control target key end

     0   :  { %v2679_v3 = vmov 0.0   ;;  %vm50_vm0 = vcmask 64512   ;;  %v2680_v18 = vmov 8   ;;  %v2681_v19 = vmov 10   ;;  %s2685_s30 = smov 1   ;;  %s2686_s8 = smov 127   ;;  %s3502_s0 = inlined_call_operand.vmem [shape: f32[8,8,150], index: 0, kind: input, shape index: {}]   ;;  %s3503_s1 = inlined_call_operand.vmem [shape: f32[8,33], index: 1, kind: input, shape index: {}]   ;;  %s3504_s2 = inlined_call_operand.vmem [shape: f32[150,41], index: 2, kind: input, shape index: {}]   ;;  %s3505_s3 = inlined_call_operand.vmem [shape: f32[8,1,2], index: 3, kind: output, shape index: {}]  }
   0x1   :  { %v15_v0 = vld [vmem:[%s3502_s0 + $0x8] sm:$0xff]  ;;  %v14_v2 = vld [vmem:[%s3502_s0] sm:$0xff]  ;;  %118 = vmatprep.mubr.f32.mxu1 %v2679_v3  ;;  %260 = vmatprep.mubr.f32.mxu0 %v2679_v3  ;;  %v17_v6 = vld [vmem:[%s3502_s0 + $0x18] sm:$0xff]  ;;  %v2682_v20 = vmov 9   ;;  %v2683_v21 = vmov 11   ;;  %v2684_v25 = vmov 0.0|0.0  }
   0x2   :  { %v19_v1 = vld [vmem:[%s3502_s0 + $0x28] sm:$0xff]  ;;  %54 = vmatprep.subr.mxu1 %v15_v0  ;;  %v18_v4 = vld [vmem:[%s3502_s0 + $0x20] sm:$0xff]  ;;  %v16_v7 = vld [vmem:[%s3502_s0 + $0x10] sm:$0xff]  ;;  %2579 = vset.pattern.permute.xlu0 %v2680_v18  ;;  %vm1002_vm1 = vcmask 1045504   ;;  %vm670_vm2 = vcmask 7168   ;;  %vm760_vm3 = vcmask 171008  }
   0x3   :  { %196 = vmatprep.subr.mxu0 %v19_v1  ;;  %v2735_v5 = vld [vmem:[%s3503_s1] sm:$0xff]  ;;  %55 = vmatpush1.msra.mxu1 %v14_v2  ;;  %v23_v8 = vld [vmem:[%s3502_s0 + $0x48] sm:$0xff]  ;;  %v21_v10 = vld [vmem:[%s3502_s0 + $0x38] sm:$0xff]  ;;  %vm735_vm4 = vcmask 1039360   ;;  %vm977_vm5 = vcmask 179200   ;;  %s2693_s4 = smov 91  }
   0x4   :  { %197 = vmatpush1.msra.mxu0 %v18_v4  ;;  %2376 = vmatmul.mubr.msk.f32.vlgmr.msra.gmra.mrb[0].mxu1 %vm50_vm0, %v2735_v5  ;;  %v22_v9 = vld [vmem:[%s3502_s0 + $0x40] sm:$0xff]  ;;  %v20_v11 = vld [vmem:[%s3502_s0 + $0x30] sm:$0xff]  ;;  %v27_v12 = vld [vmem:[%s3502_s0 + $0x68] sm:$0xff]  ;;  %v2687_v4 = vmov 13   ;;  %s2694_s6 = smov 104   ;;  %s2695_s7 = smov 100  }
   0x5   :  { %2378 = vmatmul.mubr.msk.f32.vlgmr.msra.gmra.mrb[0].mxu0 %vm50_vm0, %v2735_v5  ;;  %125 = vmatprep.subr.mxu1 %v17_v6  ;;  %v26_v13 = vld [vmem:[%s3502_s0 + $0x60] sm:$0xff]  ;;  %v25_v14 = vld [vmem:[%s3502_s0 + $0x58] sm:$0xff]  ;;  %v24_v15 = vld [vmem:[%s3502_s0 + $0x50] sm:$0xff]  ;;  %v2688_v6 = vmov 12  }
   0x6   :  { %189 = vmatprep.mubr.f32.mxu1 %v2679_v3  ;;  %126 = vmatpush1.msra.mxu1 %v16_v7  ;;  %v29_v16 = vld [vmem:[%s3502_s0 + $0x78] sm:$0xff]  ;;  %v28_v17 = vld [vmem:[%s3502_s0 + $0x70] sm:$0xff]  ;;  %v2803_v22 = vld [vmem:[%s3504_s2] sm:$0xff]  ;;  %v2689_v7 = vmov 14  }
   0x7   :  { %338 = vmatprep.subr.mxu0 %v23_v8  ;;  %402 = vmatprep.mubr.f32.mxu0 %v2679_v3  ;;  %v2808_v23 = vld [vmem:[%s3504_s2 + $0x8] sm:$0xff]  ;;  %v2817_v26 = vld [vmem:[%s3504_s2 + $0x10] sm:$0xff]  ;;  %v2822_v27 = vld [vmem:[%s3504_s2 + $0x18] sm:$0xff] }
   0x8   :  { %339 = vmatpush1.msra.mxu0 %v22_v9  ;;  %2377 = vmatmul.mubr.msk.f32.vlgmr.msra.gmra.mrb[2].mxu1 %vm50_vm0, %v2735_v5  ;;  %v2526_v24 = vpack.c.bf16 %v2808_v23, %v2803_v22  ;;  %v2529_v28 = vpack.c.bf16 %v2822_v27, %v2817_v26  ;;  %v2830_v29 = vld [vmem:[%s3504_s2 + $0x20] sm:$0xff]  ;;  %v36_v30 = vld [vmem:[%s3504_s2 + $0x28] sm:$0xff]  ;;  %v37_v36 = vld [vmem:[%s3504_s2 + $0x30] sm:$0xff] }
   0x9   :  { %2380 = vmatmul.mubr.msk.f32.vlgmr.msra.gmra.mrb[2].mxu0 %vm50_vm0, %v2735_v5  ;;  %267 = vmatprep.subr.mxu1 %v21_v10  ;;  %v2532_v31 = vpack.c.bf16 %v36_v30, %v2830_v29  ;;  %v38_v37 = vld [vmem:[%s3504_s2 + $0x38] sm:$0xff]  ;;  %v39_v43 = vld [vmem:[%s3504_s2 + $0x40] sm:$0xff]  ;;  %v40_v44 = vld [vmem:[%s3504_s2 + $0x48] sm:$0xff] }
   0xa   :  { %331 = vmatprep.mubr.f32.mxu1 %v2679_v3  ;;  %268 = vmatpush1.msra.mxu1 %v20_v11  ;;  %v2535_v38 = vpack.c.bf16 %v38_v37, %v37_v36  ;;  %v2538_v45 = vpack.c.bf16 %v40_v44, %v39_v43  ;;  %v41_v50 = vld [vmem:[%s3504_s2 + $0x50] sm:$0xff]  ;;  %v42_v51 = vld [vmem:[%s3504_s2 + $0x58] sm:$0xff]  ;;  %v43_v55 = vld [vmem:[%s3504_s2 + $0x60] sm:$0xff] }
   0xb   :  { %480 = vmatprep.subr.mxu0 %v27_v12  ;;  %544 = vmatprep.mubr.f32.mxu0 %v2679_v3  ;;  %v2541_v52 = vpack.c.bf16 %v42_v51, %v41_v50  ;;  %v44_v56 = vld [vmem:[%s3504_s2 + $0x68] sm:$0xff]  ;;  %v45_v60 = vld [vmem:[%s3504_s2 + $0x70] sm:$0xff]  ;;  %v46_v61 = vld [vmem:[%s3504_s2 + $0x78] sm:$0xff] }
   0xc   :  { %481 = vmatpush1.msra.mxu0 %v26_v13  ;;  %2379 = vmatmul.mubr.msk.f32.vlgmr.msra.gmra.mrb[4].mxu1 %vm50_vm0, %v2735_v5  ;;  %v2544_v57 = vpack.c.bf16 %v44_v56, %v43_v55  ;;  %v2547_v62 = vpack.c.bf16 %v46_v61, %v45_v60  ;;  %v47_v63 = vld [vmem:[%s3504_s2 + $0x80] sm:$0xff]  ;;  %v48_v0 = vld [vmem:[%s3504_s2 + $0x88] sm:$0xff]  ;;  %v49_v2 = vld [vmem:[%s3504_s2 + $0x90] sm:$0x3f]  ;;  %s2691_s2 = smov 113  }
   0xd   :  { %2382 = vmatmul.mubr.msk.f32.vlgmr.msra.gmra.mrb[4].mxu0 %vm50_vm0, %v2735_v5  ;;  %409 = vmatprep.subr.mxu1 %v25_v14  ;;  %v2550_v1 = vpack.c.bf16 %v48_v0, %v47_v63 }
   0xe   :  { %473 = vmatprep.mubr.f32.mxu1 %v2679_v3  ;;  %410 = vmatpush1.msra.mxu1 %v24_v15 }
   0xf   :  { %551 = vmatprep.subr.mxu1 %v29_v16  ;;  %770 = vperm.xlu0 %2579, %v2735_v5  }
  0x10   :  { %2381 = vmatmul.mubr.msk.f32.vlgmr.msra.gmra.mrb[6].mxu1 %vm50_vm0, %v2735_v5  ;;  %2581 = vset.pattern.permute.xlu1 %v2681_v19 }
  0x11   :  { %552 = vmatpush1.msra.mxu1 %v28_v17  ;;  %615 = vmatprep.mubr.f32.mxu1 %v2679_v3 }
  0x12   :  { %826 = vperm.xlu1 %2581, %v2735_v5   ;;  %2463 = vmatprep.subr.mxu1 %v2679_v3 }
  0x13   :  { %2580 = vset.pattern.permute.xlu0 %v2682_v20  ;;  %2525 = vmatprep.subr.bf16.mxu0 %v2684_v25 }
  0x14   :  { %2383 = vmatmul.mubr.msk.f32.vlgmr.msra.gmra.mrb[8].mxu1 %vm50_vm0, %v2735_v5  ;;  %790 = vperm.xlu0 %2580, %v2735_v5  }
  0x15   :  { %2527 = vmatpush1.bf16.msra.mxu0 %v2526_v24 }
  0x16   :  { %2528 = vmatprep.subr.bf16.mxu0 %v2684_v25  ;;  %2584 = vset.pattern.permute.xlu1 %v2687_v4 }
  0x18   :  { %2582 = vset.pattern.permute.xlu0 %v2683_v21 }
  0x19   :  { %862 = vperm.xlu0 %2582, %v2735_v5   ;;  %2530 = vmatpush1.bf16.msra.mxu0 %v2529_v28 }
  0x1a   :  { %2531 = vmatprep.subr.bf16.mxu0 %v2684_v25 }
  0x1d   :  { %2533 = vmatpush1.bf16.msra.mxu0 %v2532_v31  ;;  %2583 = vset.pattern.permute.xlu0 %v2688_v6 }
  0x1e   :  { %2534 = vmatprep.subr.bf16.mxu0 %v2684_v25 }
  0x21   :  { %2536 = vmatpush1.bf16.msra.mxu0 %v2535_v38 }
  0x22   :  { %2537 = vmatprep.subr.bf16.mxu0 %v2684_v25 }
  0x25   :  { %2539 = vmatpush1.bf16.msra.mxu0 %v2538_v45 }
  0x26   :  { %2540 = vmatprep.subr.bf16.mxu0 %v2684_v25 }
  0x29   :  { %2542 = vmatpush1.bf16.msra.mxu0 %v2541_v52 }
  0x2a   :  { %2543 = vmatprep.subr.bf16.mxu0 %v2684_v25 }
  0x2d   :  { %2545 = vmatpush1.bf16.msra.mxu0 %v2544_v57 }
  0x2e   :  { %2546 = vmatprep.subr.bf16.mxu0 %v2684_v25 }
  0x31   :  { %2548 = vmatpush1.bf16.msra.mxu0 %v2547_v62 }
  0x32   :  { %2549 = vmatprep.subr.bf16.mxu0 %v2684_v25 }
  0x35   :  { %2551 = vmatpush1.bf16.msra.mxu0 %v2550_v1 }
  0x36   :  { %1042 = vmatprep.subr.mxu0 %v2679_v3 }
  0x39   :  { %2400 = vmatpush1.msk.msra.mxu0 %vm1002_vm1, %v49_v2 }
  0x8e   :  { %v2981_v8 = vpop.permute.xlu0 %770 }
  0x91   :  { %v2985_v10 = vpop.permute.xlu1 %826 }
  0x93   :  { %v2983_v9 = vpop.permute.xlu0 %790 }
  0x98   :  { %v2987_v11 = vpop.permute.xlu0 %862 }
  0xd7   :  { %v2836_v32 = vpop.f32.mrb[0].mxu1 }
  0xd8   :  { %v2838_v33 = vpop.f32.mrb[0].mxu0  ;;  %638 = vrot.lane.b32.xlu1 %v2836_v32, %s2685_s30  ;;  %v2844_v34 = vpop.f32.mrb[1].mxu1  ;;  %v793_v28 = vmul.f32 %v2983_v9, %v2836_v32 }
  0xd9   :  { %646 = vrot.lane.b32.xlu0 %v2838_v33, %s2685_s30  ;;  %v2846_v35 = vpop.f32.mrb[1].mxu0  ;;  %v794_v30 = vmul.f32 %v2983_v9, %v2844_v34 }
  0xda   :  { %v798_v0 = vmul.f32 %v2983_v9, %v2846_v35 }
  0xdb   :  { %v2855_v39 = vpop.f32.mrb[2].mxu1 }
  0xdc   :  { %v2857_v40 = vpop.f32.mrb[2].mxu0  ;;  %703 = vrot.lane.b32.xlu1 %v2836_v32, %s2686_s8  ;;  %v2863_v41 = vpop.f32.mrb[3].mxu1  ;;  %v795_v2 = vmul.f32 %v2983_v9, %v2855_v39 }
  0xdd   :  { %713 = vrot.lane.b32.xlu0 %v2846_v35, %s2686_s8  ;;  %v2865_v42 = vpop.f32.mrb[3].mxu0 }
  0xdf   :  { %v2874_v46 = vpop.f32.mrb[4].mxu1 }
  0xe0   :  { %v2876_v47 = vpop.f32.mrb[4].mxu0  ;;  %711 = vrot.lane.b32.xlu1 %v2838_v33, %s2686_s8  ;;  %v2882_v48 = vpop.f32.mrb[5].mxu1 }
  0xe1   :  { %642 = vrot.lane.b32.xlu0 %v2855_v39, %s2685_s30  ;;  %v2884_v49 = vpop.f32.mrb[5].mxu0 }
  0xe3   :  { %v2893_v53 = vpop.f32.mrb[6].mxu1 }
  0xe4   :  { %640 = vrot.lane.b32.xlu1 %v2844_v34, %s2685_s30  ;;  %v2899_v54 = vpop.f32.mrb[7].mxu1 }
  0xe5   :  { %654 = vrot.lane.b32.xlu0 %v2857_v40, %s2685_s30 }
  0xe7   :  { %v2908_v58 = vpop.f32.mrb[8].mxu1 }
  0xe8   :  { %705 = vrot.lane.b32.xlu1 %v2844_v34, %s2686_s8  ;;  %v2914_v59 = vpop.f32.mrb[9].mxu1 }
  0xe9   :  { %709 = vrot.lane.b32.xlu0 %v2863_v41, %s2686_s8 }
  0xec   :  { %648 = vrot.lane.b32.xlu1 %v2846_v35, %s2685_s30 }
  0xed   :  { %721 = vrot.lane.b32.xlu0 %v2865_v42, %s2686_s8 }
  0xf0   :  { %707 = vrot.lane.b32.xlu1 %v2855_v39, %s2686_s8 }
  0xf1   :  { %650 = vrot.lane.b32.xlu0 %v2874_v46, %s2685_s30 }
  0xf4   :  { %719 = vrot.lane.b32.xlu1 %v2857_v40, %s2686_s8 }
  0xf5   :  { %662 = vrot.lane.b32.xlu0 %v2876_v47, %s2685_s30 }
  0xf8   :  { %644 = vrot.lane.b32.xlu1 %v2863_v41, %s2685_s30 }
  0xf9   :  { %717 = vrot.lane.b32.xlu0 %v2882_v48, %s2686_s8 }
  0xfc   :  { %656 = vrot.lane.b32.xlu1 %v2865_v42, %s2685_s30 }
  0xfd   :  { %729 = vrot.lane.b32.xlu0 %v2884_v49, %s2686_s8 }
 0x100   :  { %715 = vrot.lane.b32.xlu1 %v2874_v46, %s2686_s8 }
 0x101   :  { %658 = vrot.lane.b32.xlu0 %v2893_v53, %s2685_s30 }
 0x104   :  { %652 = vrot.lane.b32.xlu1 %v2882_v48, %s2685_s30 }
 0x105   :  { %725 = vrot.lane.b32.xlu0 %v2899_v54, %s2686_s8 }
 0x108   :  { %664 = vrot.lane.b32.xlu1 %v2884_v49, %s2685_s30 }
 0x109   :  { %666 = vrot.lane.b32.xlu0 %v2908_v58, %s2685_s30 }
 0x10c   :  { %723 = vrot.lane.b32.xlu1 %v2893_v53, %s2686_s8 }
 0x10d   :  { %733 = vrot.lane.b32.xlu0 %v2914_v59, %s2686_s8 }
 0x110   :  { %660 = vrot.lane.b32.xlu1 %v2899_v54, %s2685_s30 }
 0x111   :  { %1185 = vperm.xlu0 %2583, %v2735_v5  }
 0x114   :  { %727 = vrot.lane.b32.xlu1 %v2876_v47, %s2686_s8 }
 0x118   :  { %668 = vrot.lane.b32.xlu1 %v2914_v59, %s2685_s30 }
 0x11c   :  { %731 = vrot.lane.b32.xlu1 %v2908_v58, %s2686_s8 }
 0x120   :  { %1197 = vperm.xlu1 %2584, %v2735_v5  }
 0x124   :  { %2585 = vset.pattern.permute.xlu1 %v2689_v7 }
 0x125   :  { %1217 = vperm.xlu1 %2585, %v2735_v5  }
 0x14a   :  { %v639_v13 = vpop.permute.xlu1 %638 }
 0x14b   :  { %v647_v12 = vpop.permute.xlu0 %646  ;;  %v695_v18 = vsel %vm670_vm2, 0.0, %v639_v13 }
 0x14c   :  { %v773_v24 = vmul.f32 %v2981_v8, %v695_v18  ;;  %v697_v56 = vsel %vm670_vm2, 0.0, %v647_v12 }
 0x14d   :  { %v777_v4 = vmul.f32 %v2981_v8, %v697_v56 }
 0x14e   :  { %v704_v15 = vpop.permute.xlu1 %703  ;;  %v809_v43 = vadd.f32 %v793_v28, %v773_v24 }
 0x14f   :  { %v714_v14 = vpop.permute.xlu0 %713 }
 0x150   :  { %v763_v6 = vsel %vm760_vm3, %v714_v14, 0.0 }
 0x152   :  { %v712_v16 = vpop.permute.xlu1 %711 }
 0x153   :  { %v2989_v17 = vpop.permute.xlu0 %642  ;;  %v738_v1 = vsel %vm735_vm4, %v712_v16, %v714_v14  ;;  %v834_v14 = vmul.f32 %v2985_v10, %v763_v6 }
 0x154   :  { %v696_v32 = vsel %vm670_vm2, 0.0, %v2989_v17 }
 0x155   :  { %v775_v60 = vmul.f32 %v2981_v8, %v696_v32 }
 0x156   :  { %v641_v19 = vpop.permute.xlu1 %640 }
 0x157   :  { %v2992_v20 = vpop.permute.xlu0 %654  ;;  %v671_v21 = vsel %vm670_vm2, %v639_v13, %v641_v19  ;;  %v833_v19 = vmul.f32 %v2985_v10, %v738_v1  ;;  %v811_v39 = vadd.f32 %v795_v2, %v775_v60 }
 0x158   :  { %v774_v25 = vmul.f32 %v2981_v8, %v671_v21 }
 0x15a   :  { %v706_v31 = vpop.permute.xlu1 %705  ;;  %v810_v44 = vadd.f32 %v794_v30, %v774_v25 }
 0x15b   :  { %v710_v36 = vpop.permute.xlu0 %709  ;;  %v736_v37 = vsel %vm735_vm4, %v704_v15, %v706_v31  ;;  %v761_v38 = vsel %vm760_vm3, %v706_v31, 0.0  ;;  %v797_v15 = vmul.f32 %v2983_v9, %v2838_v33 }
 0x15c   :  { %v829_v45 = vmul.f32 %v2985_v10, %v736_v37  ;;  %v830_v50 = vmul.f32 %v2985_v10, %v761_v38 }
 0x15d   :  { %v813_v28 = vadd.f32 %v797_v15, %v777_v4 }
 0x15e   :  { %v845_v51 = vadd.f32 %v829_v45, %v809_v43  ;;  %v846_v52 = vadd.f32 %v830_v50, %v810_v44  ;;  %v649_v34 = vpop.permute.xlu1 %648  ;;  %v699_v43 = vsel %vm670_vm2, 0.0, %v2992_v20  ;;  %v801_v44 = vmul.f32 %v2983_v9, %v2857_v40 }
 0x15f   :  { %v722_v55 = vpop.permute.xlu0 %721  ;;  %v673_v57 = vsel %vm670_vm2, %v647_v12, %v649_v34  ;;  %v849_v38 = vadd.f32 %v833_v19, %v813_v28 }
 0x160   :  { %v778_v61 = vmul.f32 %v2981_v8, %v673_v57  ;;  %v3012_v62 = vadd.f32 %v2987_v11, %v846_v52  ;;  %v3015_v63 = vadd.f32 %v2987_v11, %v845_v51  ;;  %v781_v51 = vmul.f32 %v2981_v8, %v699_v43 }
 0x161   :  { %v762_v52 = vsel %vm760_vm3, %v710_v36, 0.0  ;;  %v796_v57 = vmul.f32 %v2983_v9, %v2863_v41  ;;  %v765_v41 = vsel %vm760_vm3, %v722_v55, 0.0 }
 0x162   :  { %v708_v7 = vpop.permute.xlu1 %707  ;;  %v898_v13 = vmin.f32 %v3012_v62, 0.0  ;;  %v814_v18 = vadd.f32 %v798_v0, %v778_v61  ;;  %v897_v16 = vmin.f32 %v3015_v63, 0.0  ;;  %v3055_v61 = vadd.f32 %v2987_v11, %v849_v38 }
 0x163   :  { %v3024_v12 = vpop.permute.xlu0 %650  ;;  %v737_v35 = vsel %vm735_vm4, %v708_v7, %v710_v36  ;;  %v802_v0 = vmul.f32 %v2983_v9, %v2865_v42  ;;  %v799_v36 = vmul.f32 %v2983_v9, %v2874_v46  ;;  %v832_v1 = vmul.f32 %v2985_v10, %v762_v52 }
 0x164   :  { %v831_v21 = vmul.f32 %v2985_v10, %v737_v35  ;;  %v915_v24 = vmul.f32 1.442695, %v898_v13  ;;  %v913_v25 = vmul.f32 1.442695, %v897_v16  ;;  %v850_v33 = vadd.f32 %v834_v14, %v814_v18 }
 0x165   :  { %v817_v7 = vadd.f32 %v801_v44, %v781_v51  ;;  %v901_v19 = vmin.f32 %v3055_v61, 0.0  ;;  %vm882_vm6 = vcmp.gt.f32.partialorder %v3012_v62, 0.0  ;;  %vm881_vm7 = vcmp.gt.f32.partialorder %v3015_v63, 0.0 }
 0x166   :  { %v847_v30 = vadd.f32 %v831_v21, %v811_v39  ;;  %v720_v31 = vpop.permute.xlu1 %719  ;;  %2598 = vpow2.f32 %v915_v24  ;;  %v3048_v56 = vadd.f32 %v2987_v11, %v850_v33  ;;  %v838_v21 = vmul.f32 %v2985_v10, %v765_v41 }
 0x167   :  { %v3034_v37 = vpop.permute.xlu0 %662  ;;  %2600 = vpow2.f32 %v913_v25  ;;  %v740_v40 = vsel %vm735_vm4, %v720_v31, %v722_v55  ;;  %v800_v41 = vmul.f32 %v2983_v9, %v2882_v48  ;;  %vm885_vm11 = vcmp.gt.f32.partialorder %v3055_v61, 0.0 }
 0x168   :  { %v3041_v32 = vadd.f32 %v2987_v11, %v847_v30  ;;  %v837_v13 = vmul.f32 %v2985_v10, %v740_v40  ;;  %v902_v46 = vmin.f32 %v3048_v56, 0.0  ;;  %v921_v40 = vmul.f32 1.442695, %v901_v19 }
 0x169   :  { %vm886_vm8 = vcmp.gt.f32.partialorder %v3048_v56, 0.0 }
 0x16a   :  { %v645_v45 = vpop.permute.xlu1 %644  ;;  %v899_v6 = vmin.f32 %v3041_v32, 0.0  ;;  %v853_v31 = vadd.f32 %v837_v13, %v817_v7  ;;  %v923_v43 = vmul.f32 1.442695, %v902_v46  ;;  %vm883_vm10 = vcmp.gt.f32.partialorder %v3041_v32, 0.0 }
 0x16b   :  { %v718_v50 = vpop.permute.xlu0 %717  ;;  %v672_v34 = vsel %vm670_vm2, %v2989_v17, %v645_v45  ;;  %v698_v17 = vsel %vm670_vm2, 0.0, %v3024_v12 }
 0x16c   :  { %v776_v60 = vmul.f32 %v2981_v8, %v672_v34  ;;  %v779_v35 = vmul.f32 %v2981_v8, %v698_v17  ;;  %v917_v30 = vmul.f32 1.442695, %v899_v6 }
 0x16e   :  { %v812_v2 = vadd.f32 %v796_v57, %v776_v60  ;;  %v657_v4 = vpop.permute.xlu1 %656  ;;  %v815_v44 = vadd.f32 %v799_v36, %v779_v35  ;;  %v764_v60 = vsel %vm760_vm3, %v718_v50, 0.0  ;;  %2602 = vpow2.f32 %v917_v30 }
 0x16f   :  { %v675_v42 = vsel %vm670_vm2, %v2992_v20, %v657_v4  ;;  %v3069_v15 = vpop.permute.xlu0 %729  ;;  %2604 = vpow2.f32 %v923_v43 }
 0x170   :  { %v2599_v18 = vpop.eup %2598  ;;  %v848_v16 = vadd.f32 %v832_v1, %v812_v2  ;;  %v782_v55 = vmul.f32 %v2981_v8, %v675_v42  ;;  %v767_v48 = vsel %vm760_vm3, %v3069_v15, 0.0 }
 0x171   :  { %v2601_v39 = vpop.eup %2600  ;;  %v2385_v24 = vadd.f32 -1.0, %v2599_v18 }
 0x172   :  { %v818_v20 = vadd.f32 %v802_v0, %v782_v55  ;;  %v716_v14 = vpop.permute.xlu1 %715  ;;  %v2384_v25 = vadd.f32 -1.0, %v2601_v39  ;;  %v3079_v28 = vadd.f32 %v2987_v11, %v848_v16  ;;  %v806_v16 = vmul.f32 %v2983_v9, %v2884_v49 }
 0x173   :  { %v739_v33 = vsel %vm735_vm4, %v716_v14, %v718_v50  ;;  %v962_v38 = vsel %vm882_vm6, %v3012_v62, %v2385_v24  ;;  %v659_v34 = vpop.permute.xlu0 %658  ;;  %v701_v24 = vsel %vm670_vm2, 0.0, %v3034_v37  ;;  %v842_v14 = vmul.f32 %v2985_v10, %v767_v48 }
 0x174   :  { %v854_v45 = vadd.f32 %v838_v21, %v818_v20  ;;  %v835_v51 = vmul.f32 %v2985_v10, %v739_v33  ;;  %2401 = vmatprep.mubr.msk.f32.mxu0 %vm977_vm5, %v962_v38  ;;  %v961_v52 = vsel %vm881_vm7, %v3015_v63, %v2384_v25  ;;  %v900_v57 = vmin.f32 %v3079_v28, 0.0 }
 0x175   :  { %1071 = vmatmul.mubr.f32.vlgmr.msra.gmra.mrb[6].mxu0 %v961_v52  ;;  %v3094_v63 = vadd.f32 %v2987_v11, %v853_v31  ;;  %v700_v4 = vsel %vm670_vm2, 0.0, %v659_v34  ;;  %v803_v21 = vmul.f32 %v2983_v9, %v2893_v53  ;;  %v805_v33 = vmul.f32 %v2983_v9, %v2876_v47 }
 0x176   :  { %v851_v0 = vadd.f32 %v835_v51, %v815_v44  ;;  %v653_v17 = vpop.permute.xlu1 %652  ;;  %v3089_v62 = vadd.f32 %v2987_v11, %v854_v45  ;;  %v919_v1 = vmul.f32 1.442695, %v900_v57  ;;  %v783_v55 = vmul.f32 %v2981_v8, %v700_v4 }
 0x177   :  { %v674_v36 = vsel %vm670_vm2, %v3024_v12, %v653_v17  ;;  %v836_v12 = vmul.f32 %v2985_v10, %v764_v60  ;;  %v726_v46 = vpop.permute.xlu0 %725  ;;  %v905_v35 = vmin.f32 %v3094_v63, 0.0  ;;  %v804_v53 = vmul.f32 %v2983_v9, %v2899_v54 }
 0x178   :  { %v780_v2 = vmul.f32 %v2981_v8, %v674_v36  ;;  %v3100_v50 = vadd.f32 %v2987_v11, %v851_v0  ;;  %2606 = vpow2.f32 %v919_v1  ;;  %v906_v6 = vmin.f32 %v3089_v62, 0.0  ;;  %v2603_v44 = vpop.eup %2602 }
 0x179   :  { %2608 = vpow2.f32 %v921_v40  ;;  %v929_v43 = vmul.f32 1.442695, %v905_v35  ;;  %v2605_v52 = vpop.eup %2604  ;;  %v785_v57 = vmul.f32 %v2981_v8, %v701_v24  ;;  %v766_v47 = vsel %vm760_vm3, %v726_v46, 0.0 }
 0x17a   :  { %v816_v7 = vadd.f32 %v800_v41, %v780_v2  ;;  %v665_v13 = vpop.permute.xlu1 %664  ;;  %v903_v42 = vmin.f32 %v3100_v50, 0.0  ;;  %v931_v20 = vmul.f32 1.442695, %v906_v6  ;;  %v2386_v41 = vadd.f32 -1.0, %v2603_v44 }
 0x17b   :  { %v677_v18 = vsel %vm670_vm2, %v3034_v37, %v665_v13  ;;  %v819_v37 = vadd.f32 %v803_v21, %v783_v55  ;;  %v667_v40 = vpop.permute.xlu0 %666  ;;  %vm884_vm9 = vcmp.gt.f32.partialorder %v3079_v28, 0.0  ;;  %vm887_vm13 = vcmp.gt.f32.partialorder %v3100_v50, 0.0 }
 0x17c   :  { %v852_v19 = vadd.f32 %v836_v12, %v816_v7  ;;  %v786_v39 = vmul.f32 %v2981_v8, %v677_v18  ;;  %v925_v49 = vmul.f32 1.442695, %v903_v42  ;;  %2610 = vpow2.f32 %v931_v20 }
 0x17d   :  { %v2389_v7 = vadd.f32 -1.0, %v2605_v52  ;;  %v840_v42 = vmul.f32 %v2985_v10, %v766_v47  ;;  %v702_v24 = vsel %vm670_vm2, 0.0, %v667_v40  ;;  %vm890_vm14 = vcmp.gt.f32.partialorder %v3089_v62, 0.0 }
 0x17e   :  { %v822_v25 = vadd.f32 %v806_v16, %v786_v39  ;;  %v724_v30 = vpop.permute.xlu1 %723  ;;  %v3121_v31 = vadd.f32 %v2987_v11, %v852_v19  ;;  %2612 = vpow2.f32 %v925_v49  ;;  %v821_v16 = vadd.f32 %v805_v33, %v785_v57 }
 0x17f   :  { %v741_v38 = vsel %vm735_vm4, %v724_v30, %v726_v46  ;;  %2614 = vpow2.f32 %v929_v43  ;;  %v734_v55 = vpop.permute.xlu0 %733  ;;  %v963_v39 = vsel %vm883_vm10, %v3041_v32, %v2386_v41  ;;  %v787_v43 = vmul.f32 %v2981_v8, %v702_v24 }
 0x180   :  { %v858_v45 = vadd.f32 %v842_v14, %v822_v25  ;;  %v839_v51 = vmul.f32 %v2985_v10, %v741_v38  ;;  %v904_v60 = vmin.f32 %v3121_v31, 0.0  ;;  %v966_v14 = vsel %vm886_vm8, %v3048_v56, %v2389_v7 }
 0x181   :  { %vm888_vm12 = vcmp.gt.f32.partialorder %v3121_v31, 0.0  ;;  %vm889_vm15 = vcmp.gt.f32.partialorder %v3094_v63, 0.0  ;;  %vm1896_vm10 = vcmask 1044480  }
 0x182   :  { %v855_v0 = vadd.f32 %v839_v51, %v819_v37  ;;  %v661_v17 = vpop.permute.xlu1 %660  ;;  %v3134_v54 = vadd.f32 %v2987_v11, %v858_v45  ;;  %v2607_v36 = vpop.eup %2606  ;;  %v927_v2 = vmul.f32 1.442695, %v904_v60  ;;  %v808_v37 = vmul.f32 %v2983_v9, %v2914_v59 }
 0x183   :  { %v676_v1 = vsel %vm670_vm2, %v659_v34, %v661_v17  ;;  %v2609_v4 = vpop.eup %2608  ;;  %v2387_v12 = vadd.f32 -1.0, %v2607_v36  ;;  %v807_v60 = vmul.f32 %v2983_v9, %v2908_v58 }
 0x184   :  { %v784_v6 = vmul.f32 %v2981_v8, %v676_v1  ;;  %v3139_v13 = vadd.f32 %v2987_v11, %v855_v0  ;;  %2616 = vpow2.f32 %v927_v2  ;;  %v910_v35 = vmin.f32 %v3134_v54, 0.0 }
 0x185   :  { %v964_v34 = vsel %vm884_vm9, %v3079_v28, %v2387_v12  ;;  %v2388_v21 = vadd.f32 -1.0, %v2609_v4  ;;  %v823_v17 = vadd.f32 %v807_v60, %v787_v43  ;;  %vm2690_vm9 = vmmov 0  }
 0x186   :  { %v820_v48 = vadd.f32 %v804_v53, %v784_v6  ;;  %v728_v46 = vpop.permute.xlu1 %727  ;;  %v907_v18 = vmin.f32 %v3139_v13, 0.0  ;;  %2402 = vmatprep.mubr.msk.f32.mxu0 %vm977_vm5, %v964_v34  ;;  %v939_v33 = vmul.f32 1.442695, %v910_v35  ;;  %v2611_v38 = vpop.eup %2610  ;;  %2465 = vmatprep.mubr.msk.f32.mxu1 %vm2690_vm9, %v2679_v3 }
 0x187   :  { %v742_v19 = vsel %vm735_vm4, %v728_v46, %v3069_v15  ;;  %1076 = vmatmul.mubr.f32.gmra.mrb[8].mxu0 %v963_v39  ;;  %v768_v15 = vsel %vm760_vm3, %v734_v55, 0.0  ;;  %v965_v56 = vsel %vm885_vm11, %v3055_v61, %v2388_v21  ;;  %v2393_v41 = vadd.f32 -1.0, %v2611_v38 }
 0x188   :  { %v856_v20 = vadd.f32 %v840_v42, %v820_v48  ;;  %v841_v28 = vmul.f32 %v2985_v10, %v742_v19  ;;  %2403 = vmatprep.mubr.msk.f32.mxu0 %vm977_vm5, %v966_v14  ;;  %v933_v25 = vmul.f32 1.442695, %v907_v18  ;;  %v2613_v53 = vpop.eup %2612  ;;  %vm891_vm3 = vcmp.gt.f32.partialorder %v3139_v13, 0.0 }
 0x189   :  { %v2615_v57 = vpop.eup %2614  ;;  %v2390_v1 = vadd.f32 -1.0, %v2613_v53 }
 0x18a   :  { %v857_v30 = vadd.f32 %v841_v28, %v821_v16  ;;  %v669_v32 = vpop.permute.xlu1 %668  ;;  %v3160_v49 = vadd.f32 %v2987_v11, %v856_v20  ;;  %2618 = vpow2.f32 %v933_v25  ;;  %v2392_v48 = vadd.f32 -1.0, %v2615_v57 }
 0x18b   :  { %v678_v44 = vsel %vm670_vm2, %v667_v40, %v669_v32  ;;  %1081 = vmatmul.mubr.f32.gmra.mrb[10].mxu0 %v965_v56  ;;  %v844_v40 = vmul.f32 %v2985_v10, %v768_v15  ;;  %2620 = vpow2.f32 %v939_v33  ;;  %v967_v42 = vsel %vm887_vm13, %v3100_v50, %v2390_v1 }
 0x18c   :  { %v788_v45 = vmul.f32 %v2981_v8, %v678_v44  ;;  %v908_v51 = vmin.f32 %v3160_v49, 0.0  ;;  %v3170_v52 = vadd.f32 %v2987_v11, %v857_v30  ;;  %v969_v16 = vsel %vm889_vm15, %v3094_v63, %v2392_v48 }
 0x18d   :  { %vm892_vm1 = vcmp.gt.f32.partialorder %v3160_v49, 0.0 }
 0x18e   :  { %v824_v61 = vadd.f32 %v808_v37, %v788_v45  ;;  %v732_v47 = vpop.permute.xlu1 %731  ;;  %v935_v0 = vmul.f32 1.442695, %v908_v51  ;;  %v909_v59 = vmin.f32 %v3170_v52, 0.0  ;;  %v2617_v8 = vpop.eup %2616  ;;  %vm893_vm6 = vcmp.gt.f32.partialorder %v3170_v52, 0.0 }
 0x18f   :  { %v743_v36 = vsel %vm735_vm4, %v732_v47, %v734_v55  ;;  %v2391_v6 = vadd.f32 -1.0, %v2617_v8  ;;  %vm894_vm4 = vcmp.gt.f32.partialorder %v3134_v54, 0.0  ;;  %v2592_v8 = vpack.i.bf16 %v2822_v27, %v2817_v26 }
 0x190   :  { %v860_v2 = vadd.f32 %v844_v40, %v824_v61  ;;  %v843_v4 = vmul.f32 %v2985_v10, %v743_v36  ;;  %2622 = vpow2.f32 %v935_v0  ;;  %v937_v58 = vmul.f32 1.442695, %v909_v59  ;;  %v3252_v36 = vpop.permute.xlu0 %1185 }
 0x191   :  { %v968_v12 = vsel %vm888_vm12, %v3121_v31, %v2391_v6  ;;  %v970_v10 = vsel %vm890_vm14, %v3089_v62, %v2393_v41  ;;  %v2692_v61 = vmov 23   ;;  %v2587_v59 = vpack.i.bf16 %v2808_v23, %v2803_v22 }
 0x192   :  { %v859_v9 = vadd.f32 %v843_v4, %v823_v17  ;;  %v880_v7 = vadd.f32 %v2987_v11, %v860_v2  ;;  %2404 = vmatprep.mubr.msk.f32.mxu0 %vm977_vm5, %v968_v12  ;;  %2624 = vpow2.f32 %v937_v58  ;;  %2586 = vset.pattern.permute.xlu1 %v2692_v61 }
 0x193   :  { %1086 = vmatmul.mubr.f32.gmra.mrb[12].mxu0 %v967_v42  ;;  %2597 = vset.pattern.permute.xlu0 %v2692_v61 }
 0x194   :  { %v912_v34 = vmin.f32 %v880_v7, 0.0  ;;  %v879_v46 = vadd.f32 %v2987_v11, %v859_v9  ;;  %2405 = vmatprep.mubr.msk.f32.mxu0 %vm977_vm5, %v970_v10  ;;  %v2619_v35 = vpop.eup %2618  ;;  %vm896_vm7 = vcmp.gt.f32.partialorder %v880_v7, 0.0 }
 0x195   :  { %v2621_v50 = vpop.eup %2620  ;;  %v2394_v39 = vadd.f32 -1.0, %v2619_v35 }
 0x196   :  { %v943_v31 = vmul.f32 1.442695, %v912_v34  ;;  %v911_v18 = vmin.f32 %v879_v46, 0.0  ;;  %v2397_v21 = vadd.f32 -1.0, %v2621_v50  ;;  %vm895_vm8 = vcmp.gt.f32.partialorder %v879_v46, 0.0 }
 0x197   :  { %1091 = vmatmul.mubr.f32.gmra.mrb[14].mxu0 %v969_v16  ;;  %v971_v63 = vsel %vm891_vm3, %v3139_v13, %v2394_v39 }
 0x198   :  { %2626 = vpow2.f32 %v943_v31  ;;  %v941_v55 = vmul.f32 1.442695, %v911_v18  ;;  %v974_v28 = vsel %vm894_vm4, %v3134_v54, %v2397_v21 }
 0x19a   :  { %v2623_v19 = vpop.eup %2622  ;;  %2628 = vpow2.f32 %v941_v55 }
 0x19b   :  { %v2395_v62 = vadd.f32 -1.0, %v2623_v19 }
 0x19c   :  { %v2625_v11 = vpop.eup %2624 }
 0x19d   :  { %v972_v24 = vsel %vm892_vm1, %v3160_v49, %v2395_v62  ;;  %v2396_v20 = vadd.f32 -1.0, %v2625_v11 }
 0x19e   :  { %2406 = vmatprep.mubr.msk.f32.mxu0 %vm977_vm5, %v972_v24 }
 0x19f   :  { %1096 = vmatmul.mubr.f32.gmra.mrb[16].mxu0 %v971_v63  ;;  %v973_v25 = vsel %vm893_vm6, %v3170_v52, %v2396_v20  ;;  %v3250_v17 = vpop.permute.xlu1 %1197  ;;  %vm2015_vm6 = vcmask 31744  }
 0x1a0   :  { %2407 = vmatprep.mubr.msk.f32.mxu0 %vm977_vm5, %v974_v28 }
 0x1a2   :  { %v2627_v14 = vpop.eup %2626 }
 0x1a3   :  { %1101 = vmatmul.mubr.f32.gmra.mrb[18].mxu0 %v973_v25  ;;  %v2399_v15 = vadd.f32 -1.0, %v2627_v14 }
 0x1a4   :  { %v2629_v30 = vpop.eup %2628  ;;  %v3254_v1 = vpop.permute.xlu1 %1217 }
 0x1a5   :  { %v976_v32 = vsel %vm896_vm7, %v880_v7, %v2399_v15  ;;  %v2398_v49 = vadd.f32 -1.0, %v2629_v30  ;;  %vm2267_vm7 = vcmask 8192  }
 0x1a6   :  { %2408 = vmatprep.mubr.msk.f32.mxu0 %vm977_vm5, %v976_v32  ;;  %vm1175_vm5 = vcmask 293888  }
 0x1a7   :  { %v975_v13 = vsel %vm895_vm8, %v879_v46, %v2398_v49 }
 0x1a8   :  { %1106 = vmatmul.mubr.f32.gmra.mrb[20].mxu0 %v975_v13 }
 0x248   :  { %v1072_v33 = vpop.f32.mrb[6].mxu0 }
 0x249   :  { %v1074_v54 = vpop.f32.mrb[7].mxu0  ;;  %1119 = vrot.lane.b32.xlu0 %v1072_v33, %s2685_s30  ;;  %1151 = vrot.lane.b32.xlu1 %v1072_v33, %s2686_s8  ;;  %v1200_v26 = vmul.f32 %v3250_v17, %v1072_v33 }
 0x25a   :  { %v1077_v38 = vpop.f32.mrb[8].mxu0 }
 0x25b   :  { %v1079_v43 = vpop.f32.mrb[9].mxu0  ;;  %1121 = vrot.lane.b32.xlu0 %v1077_v38, %s2685_s30  ;;  %1153 = vrot.lane.b32.xlu1 %v1077_v38, %s2686_s8  ;;  %v1201_v7 = vmul.f32 %v3250_v17, %v1077_v38 }
 0x25e   :  { %v3207_v44 = vpop.f32.mrb[10].mxu0 }
 0x25f   :  { %v1084_v56 = vpop.f32.mrb[11].mxu0  ;;  %1123 = vrot.lane.b32.xlu0 %v3207_v44, %s2685_s30  ;;  %1240 = vrot.lane.b32.xlu1 %v2735_v5, %s2691_s2  ;;  %v1202_v16 = vmul.f32 %v3250_v17, %v3207_v44 }
 0x263   :  { %1155 = vrot.lane.b32.xlu0 %v3207_v44, %s2686_s8 }
 0x266   :  { %v3214_v53 = vpop.f32.mrb[12].mxu0 }
 0x267   :  { %v1089_v37 = vpop.f32.mrb[13].mxu0  ;;  %1157 = vrot.lane.b32.xlu0 %v3214_v53, %s2686_s8  ;;  %1125 = vrot.lane.b32.xlu1 %v3214_v53, %s2685_s30  ;;  %v1203_v20 = vmul.f32 %v3250_v17, %v3214_v53 }
 0x26a   :  { %v3220_v45 = vpop.f32.mrb[14].mxu0 }
 0x26b   :  { %v1094_v51 = vpop.f32.mrb[15].mxu0  ;;  %1159 = vrot.lane.b32.xlu0 %v3220_v45, %s2686_s8  ;;  %1127 = vrot.lane.b32.xlu1 %v3220_v45, %s2685_s30  ;;  %v1204_v13 = vmul.f32 %v3250_v17, %v3220_v45 }
 0x272   :  { %v3226_v52 = vpop.f32.mrb[16].mxu0 }
 0x273   :  { %v1099_v57 = vpop.f32.mrb[17].mxu0  ;;  %1161 = vrot.lane.b32.xlu0 %v3226_v52, %s2686_s8  ;;  %1129 = vrot.lane.b32.xlu1 %v3226_v52, %s2685_s30  ;;  %v1205_v51 = vmul.f32 %v3250_v17, %v3226_v52 }
 0x276   :  { %v3232_v60 = vpop.f32.mrb[18].mxu0 }
 0x277   :  { %v1104_v40 = vpop.f32.mrb[19].mxu0  ;;  %1163 = vrot.lane.b32.xlu0 %v3232_v60, %s2686_s8  ;;  %1131 = vrot.lane.b32.xlu1 %v3232_v60, %s2685_s30  ;;  %v1206_v52 = vmul.f32 %v3250_v17, %v3232_v60 }
 0x27b   :  { %v3238_v47 = vpop.f32.mrb[20].mxu0 }
 0x27c   :  { %1165 = vrot.lane.b32.xlu0 %v3238_v47, %s2686_s8  ;;  %1133 = vrot.lane.b32.xlu1 %v3238_v47, %s2685_s30  ;;  %v1109_v0 = vpop.f32.mrb[21].mxu0  ;;  %v1207_v60 = vmul.f32 %v3250_v17, %v3238_v47  ;;  %s2697_s8 = smov 97  }
 0x280   :  { %1237 = vperm.xlu1 %2586, %v2735_v5   ;;  %2588 = vrot.lane.b32.xlu0 %v2587_v59, %s2693_s4 }
 0x284   :  { %2593 = vrot.lane.b32.xlu1 %v2592_v8, %s2693_s4  ;;  %1865 = vrot.lane.b32.xlu0 %v2830_v29, %s2693_s4 }
 0x2bb   :  { %v1120_v41 = vpop.permute.xlu0 %1119  ;;  %v1152_v2 = vpop.permute.xlu1 %1151 }
 0x2bc   :  { %v1143_v22 = vsel %vm670_vm2, 0.0, %v1120_v41  ;;  %v1176_v5 = vsel %vm1175_vm5, %v1152_v2, 0.0 }
 0x2bd   :  { %v1188_v23 = vmul.f32 %v3252_v36, %v1143_v22  ;;  %v1220_v29 = vmul.f32 %v3254_v1, %v1176_v5 }
 0x2bf   :  { %v1208_v27 = vadd.f32 %v1200_v26, %v1188_v23 }
 0x2c1   :  { %v1228_v4 = vadd.f32 %v1220_v29, %v1208_v27 }
 0x2c3   :  { %2464 = vmatpush3.msra.mxu1 %v1228_v4 }
 0x2c4   :  { %2468 = vmatprep.subr.mxu1 %v2679_v3 }
 0x2cd   :  { %v1122_v6 = vpop.permute.xlu0 %1121  ;;  %v1154_v58 = vpop.permute.xlu1 %1153 }
 0x2ce   :  { %v1144_v9 = vsel %vm670_vm2, 0.0, %v1122_v6  ;;  %v1177_v12 = vsel %vm1175_vm5, %v1154_v58, 0.0 }
 0x2cf   :  { %v1189_v42 = vmul.f32 %v3252_v36, %v1144_v9  ;;  %v1221_v10 = vmul.f32 %v3254_v1, %v1177_v12 }
 0x2d1   :  { %v1209_v48 = vadd.f32 %v1201_v7, %v1189_v42  ;;  %v1124_v34 = vpop.permute.xlu0 %1123  ;;  %v3267_v46 = vpop.permute.xlu1 %1240 }
 0x2d2   :  { %v1145_v31 = vsel %vm670_vm2, 0.0, %v1124_v34  ;;  %2466 = vmatmul.mubr.msk.f32.vlgmr.msra.gmra.mrb[10].mxu1 %vm50_vm0, %v3267_v46 }
 0x2d3   :  { %v1229_v18 = vadd.f32 %v1221_v10, %v1209_v48  ;;  %v1190_v35 = vmul.f32 %v3252_v36, %v1145_v31  ;;  %2470 = vmatprep.mubr.msk.f32.mxu1 %vm2690_vm9, %v2679_v3 }
 0x2d5   :  { %v1156_v50 = vpop.permute.xlu0 %1155  ;;  %2469 = vmatpush3.msra.mxu1 %v1229_v18  ;;  %v1210_v19 = vadd.f32 %v1202_v16, %v1190_v35 }
 0x2d6   :  { %v1178_v55 = vsel %vm1175_vm5, %v1156_v50, 0.0  ;;  %2471 = vmatmul.mubr.msk.f32.vlgmr.msra.gmra.mrb[12].mxu1 %vm50_vm0, %v3267_v46  ;;  %2473 = vmatprep.subr.mxu1 %v2679_v3 }
 0x2d7   :  { %v1222_v39 = vmul.f32 %v3254_v1, %v1178_v55  ;;  %2475 = vmatprep.mubr.msk.f32.mxu1 %vm2690_vm9, %v2679_v3 }
 0x2d9   :  { %v1230_v62 = vadd.f32 %v1222_v39, %v1210_v19  ;;  %v1158_v21 = vpop.permute.xlu0 %1157  ;;  %v1126_v11 = vpop.permute.xlu1 %1125 }
 0x2da   :  { %v1179_v24 = vsel %vm1175_vm5, %v1158_v21, 0.0  ;;  %v1146_v63 = vsel %vm670_vm2, 0.0, %v1126_v11 }
 0x2db   :  { %v1191_v28 = vmul.f32 %v3252_v36, %v1146_v63  ;;  %2474 = vmatpush3.msra.mxu1 %v1230_v62  ;;  %v1223_v14 = vmul.f32 %v3254_v1, %v1179_v24 }
 0x2dc   :  { %2476 = vmatmul.mubr.msk.f32.vlgmr.msra.gmra.mrb[14].mxu1 %vm50_vm0, %v3267_v46  ;;  %2478 = vmatprep.subr.mxu1 %v2679_v3 }
 0x2dd   :  { %v1211_v25 = vadd.f32 %v1203_v20, %v1191_v28  ;;  %v1160_v15 = vpop.permute.xlu0 %1159  ;;  %v1128_v30 = vpop.permute.xlu1 %1127  ;;  %2480 = vmatprep.mubr.msk.f32.mxu1 %vm2690_vm9, %v2679_v3 }
 0x2de   :  { %v1180_v32 = vsel %vm1175_vm5, %v1160_v15, 0.0  ;;  %v1147_v49 = vsel %vm670_vm2, 0.0, %v1128_v30 }
 0x2df   :  { %v1231_v33 = vadd.f32 %v1223_v14, %v1211_v25  ;;  %v1192_v54 = vmul.f32 %v3252_v36, %v1147_v49  ;;  %v1224_v38 = vmul.f32 %v3254_v1, %v1180_v32 }
 0x2e1   :  { %v1212_v43 = vadd.f32 %v1204_v13, %v1192_v54  ;;  %2479 = vmatpush3.msra.mxu1 %v1231_v33 }
 0x2e2   :  { %2481 = vmatmul.mubr.msk.f32.vlgmr.msra.gmra.mrb[16].mxu1 %vm50_vm0, %v3267_v46  ;;  %2483 = vmatprep.subr.mxu1 %v2679_v3 }
 0x2e3   :  { %v1232_v44 = vadd.f32 %v1224_v38, %v1212_v43  ;;  %2485 = vmatprep.mubr.msk.f32.mxu1 %vm2690_vm9, %v2679_v3 }
 0x2e5   :  { %v1162_v56 = vpop.permute.xlu0 %1161  ;;  %v1130_v53 = vpop.permute.xlu1 %1129  ;;  %2484 = vmatpush3.msra.mxu1 %v1232_v44 }
 0x2e6   :  { %v1181_v37 = vsel %vm1175_vm5, %v1162_v56, 0.0  ;;  %v1148_v45 = vsel %vm670_vm2, 0.0, %v1130_v53  ;;  %2486 = vmatmul.mubr.msk.f32.vlgmr.msra.gmra.mrb[18].mxu1 %vm50_vm0, %v3267_v46  ;;  %2488 = vmatprep.subr.mxu1 %v2679_v3 }
 0x2e7   :  { %v1193_v57 = vmul.f32 %v3252_v36, %v1148_v45  ;;  %2490 = vmatprep.mubr.msk.f32.mxu1 %vm2690_vm9, %v2679_v3  ;;  %v1225_v40 = vmul.f32 %v3254_v1, %v1181_v37 }
 0x2e9   :  { %v1213_v61 = vadd.f32 %v1205_v51, %v1193_v57  ;;  %v1164_v0 = vpop.permute.xlu0 %1163  ;;  %v1132_v59 = vpop.permute.xlu1 %1131 }
 0x2ea   :  { %v1182_v8 = vsel %vm1175_vm5, %v1164_v0, 0.0  ;;  %v1149_v41 = vsel %vm670_vm2, 0.0, %v1132_v59 }
 0x2eb   :  { %v1233_v2 = vadd.f32 %v1225_v40, %v1213_v61  ;;  %v1194_v22 = vmul.f32 %v3252_v36, %v1149_v41  ;;  %v1226_v5 = vmul.f32 %v3254_v1, %v1182_v8 }
 0x2ed   :  { %v1214_v23 = vadd.f32 %v1206_v52, %v1194_v22  ;;  %2489 = vmatpush3.msra.mxu1 %v1233_v2 }
 0x2ee   :  { %2491 = vmatmul.mubr.msk.f32.vlgmr.msra.gmra.mrb[20].mxu1 %vm50_vm0, %v3267_v46  ;;  %v1166_v26 = vpop.permute.xlu0 %1165  ;;  %v1134_v27 = vpop.permute.xlu1 %1133  ;;  %2493 = vmatprep.subr.mxu1 %v2679_v3 }
 0x2ef   :  { %v1234_v29 = vadd.f32 %v1226_v5, %v1214_v23  ;;  %v1183_v4 = vsel %vm1175_vm5, %v1166_v26, 0.0  ;;  %v1150_v6 = vsel %vm670_vm2, 0.0, %v1134_v27  ;;  %2495 = vmatprep.mubr.msk.f32.mxu1 %vm2690_vm9, %v2679_v3 }
 0x2f0   :  { %v1195_v58 = vmul.f32 %v3252_v36, %v1150_v6  ;;  %v1227_v9 = vmul.f32 %v3254_v1, %v1183_v4 }
 0x2f1   :  { %2494 = vmatpush3.msra.mxu1 %v1234_v29 }
 0x2f2   :  { %v1215_v12 = vadd.f32 %v1207_v60, %v1195_v58  ;;  %2496 = vmatmul.mubr.msk.f32.vlgmr.msra.gmra.mrb[22].mxu1 %vm50_vm0, %v3267_v46  ;;  %2498 = vmatprep.subr.mxu1 %v2679_v3  ;;  %v2589_v17 = vpop.permute.xlu0 %2588 }
 0x2f3   :  { %2500 = vmatprep.mubr.msk.f32.mxu1 %vm2690_vm9, %v2679_v3  ;;  %v2591_v36 = vunpack.i.h.bf16 %v2589_v17  ;;  %v2590_v42 = vunpack.i.l.bf16 %v2589_v17 }
 0x2f4   :  { %v1235_v7 = vadd.f32 %v1227_v9, %v1215_v12 }
 0x2f5   :  { %v2552_v1 = vpack.c.bf16 %v2591_v36, %v2590_v42 }
 0x2f6   :  { %2499 = vmatpush3.msra.mxu1 %v1235_v7  ;;  %v1866_v3 = vpop.permute.xlu0 %1865 }
 0x2f7   :  { %2501 = vmatmul.mubr.msk.f32.vlgmr.msra.gmra.mrb[24].mxu1 %vm50_vm0, %v3267_v46  ;;  %2553 = vmatprep.subr.bf16.mxu1 %v2552_v1  ;;  %v3346_v46 = vld [vmem:[%s3503_s1] sm:$0xff]  ;;  %vm1871_vm0 = vcmask 302080   ;;  %s2696_s1 = smov 96  }
 0x2f8   :  { %2555 = vmatpush3.bf16.msra.mxu1 %v2552_v1  ;;  %2004 = vrot.lane.b32.xlu0 %v3346_v46, %s2694_s6 }
 0x2f9   :  { %2096 = vrot.lane.b32.xlu1 %v3346_v46, %s2695_s7 }
 0x2ff   :  { %v3341_v47 = vpop.permute.xlu1 %1237 }
 0x303   :  { %v2594_v48 = vpop.permute.xlu1 %2593 }
 0x304   :  { %v2596_v10 = vunpack.i.h.bf16 %v2594_v48  ;;  %v2595_v34 = vunpack.i.l.bf16 %v2594_v48 }
 0x306   :  { %v2556_v31 = vpack.c.bf16 %v2596_v10, %v2595_v34 }
 0x308   :  { %2557 = vmatprep.subr.bf16.mxu1 %v2556_v31 }
 0x309   :  { %2559 = vmatpush3.bf16.msra.mxu1 %v2556_v31 }
 0x30a   :  { %2511 = vmatprep.subr.msk.mxu1 %vm1896_vm10, %v1866_v3 }
 0x30d   :  { %2512 = vmatpush3.msk.msra.mxu1 %vm1896_vm10, %v1866_v3 }
 0x3a5   :  { %v1310_v18 = vpop.f32.mrb[10].mxu1 }
 0x3a6   :  { %v2467_v35 = vpop.f32.mrb[11].mxu1  ;;  %v1311_v16 = vadd.f32 %v1310_v18, %v3341_v47 }
 0x3a7   :  { %v2005_v35 = vpop.permute.xlu0 %2004 }
 0x3a8   :  { %v1812_v50 = vmin.f32 %v1311_v16, 0.0  ;;  %vm1804_vm11 = vcmp.gt.f32.partialorder %v1311_v16, 0.0 }
 0x3a9   :  { %v1380_v55 = vpop.f32.mrb[12].mxu1 }
 0x3aa   :  { %v1381_v19 = vadd.f32 %v1380_v55, %v3341_v47  ;;  %v2472_v39 = vpop.f32.mrb[13].mxu1  ;;  %v1820_v62 = vmul.f32 1.442695, %v1812_v50 }
 0x3ac   :  { %v1813_v21 = vmin.f32 %v1381_v19, 0.0  ;;  %2630 = vpow2.f32 %v1820_v62  ;;  %vm1805_vm12 = vcmp.gt.f32.partialorder %v1381_v19, 0.0 }
 0x3ae   :  { %v1822_v11 = vmul.f32 1.442695, %v1813_v21 }
 0x3af   :  { %v1450_v24 = vpop.f32.mrb[14].mxu1 }
 0x3b0   :  { %2632 = vpow2.f32 %v1822_v11  ;;  %v1451_v63 = vadd.f32 %v1450_v24, %v3341_v47  ;;  %v2477_v20 = vpop.f32.mrb[15].mxu1 }
 0x3b2   :  { %v1814_v28 = vmin.f32 %v1451_v63, 0.0  ;;  %vm1806_vm13 = vcmp.gt.f32.partialorder %v1451_v63, 0.0 }
 0x3b4   :  { %v1824_v14 = vmul.f32 1.442695, %v1814_v28 }
 0x3b5   :  { %v1520_v25 = vpop.f32.mrb[16].mxu1 }
 0x3b6   :  { %v2631_v15 = vpop.eup %2630  ;;  %2634 = vpow2.f32 %v1824_v14  ;;  %v1521_v30 = vadd.f32 %v1520_v25, %v3341_v47  ;;  %v2482_v32 = vpop.f32.mrb[17].mxu1 }
 0x3b7   :  { %v2417_v49 = vadd.f32 -1.0, %v2631_v15 }
 0x3b8   :  { %v1815_v13 = vmin.f32 %v1521_v30, 0.0  ;;  %vm1807_vm14 = vcmp.gt.f32.partialorder %v1521_v30, 0.0 }
 0x3b9   :  { %v1590_v33 = vpop.f32.mrb[18].mxu1  ;;  %v1844_v54 = vsel %vm1804_vm11, %v1311_v16, %v2417_v49  ;;  %v2097_v16 = vpop.permute.xlu1 %2096 }
 0x3ba   :  { %v2633_v38 = vpop.eup %2632  ;;  %v1826_v43 = vmul.f32 1.442695, %v1815_v13  ;;  %v1591_v44 = vadd.f32 %v1590_v33, %v3341_v47  ;;  %v2487_v56 = vpop.f32.mrb[19].mxu1  ;;  %2513 = vmatprep.mubr.msk.f32.mxu1 %vm1871_vm0, %v1844_v54 }
 0x3bb   :  { %v2418_v53 = vadd.f32 -1.0, %v2633_v38 }
 0x3bc   :  { %2636 = vpow2.f32 %v1826_v43  ;;  %v1816_v37 = vmin.f32 %v1591_v44, 0.0  ;;  %vm1808_vm15 = vcmp.gt.f32.partialorder %v1591_v44, 0.0 }
 0x3bd   :  { %v1845_v45 = vsel %vm1805_vm12, %v1381_v19, %v2418_v53 }
 0x3be   :  { %v1828_v51 = vmul.f32 1.442695, %v1816_v37  ;;  %2514 = vmatmul.mubr.msk.f32.vlgmr.msra.gmra.mrb[26].mxu1 %vm1871_vm0, %v1845_v45 }
 0x3c0   :  { %v2635_v57 = vpop.eup %2634  ;;  %2638 = vpow2.f32 %v1828_v51 }
 0x3c1   :  { %v1660_v40 = vpop.f32.mrb[20].mxu1  ;;  %v2419_v59 = vadd.f32 -1.0, %v2635_v57 }
 0x3c2   :  { %v1661_v61 = vadd.f32 %v1660_v40, %v3341_v47  ;;  %v2492_v0 = vpop.f32.mrb[21].mxu1 }
 0x3c3   :  { %v1846_v41 = vsel %vm1806_vm13, %v1451_v63, %v2419_v59 }
 0x3c4   :  { %v1817_v8 = vmin.f32 %v1661_v61, 0.0  ;;  %2516 = vmatprep.mubr.msk.f32.mxu1 %vm1871_vm0, %v1846_v41  ;;  %vm1809_vm1 = vcmp.gt.f32.partialorder %v1661_v61, 0.0 }
 0x3c5   :  { %v1730_v52 = vpop.f32.mrb[22].mxu1 }
 0x3c6   :  { %v1830_v2 = vmul.f32 1.442695, %v1817_v8  ;;  %v1731_v22 = vadd.f32 %v1730_v52, %v3341_v47  ;;  %v2497_v5 = vpop.f32.mrb[23].mxu1  ;;  %v2637_v23 = vpop.eup %2636 }
 0x3c7   :  { %v2420_v27 = vadd.f32 -1.0, %v2637_v23 }
 0x3c8   :  { %2640 = vpow2.f32 %v1830_v2  ;;  %v1818_v26 = vmin.f32 %v1731_v22, 0.0  ;;  %vm1810_vm3 = vcmp.gt.f32.partialorder %v1731_v22, 0.0 }
 0x3c9   :  { %v1847_v6 = vsel %vm1807_vm14, %v1521_v30, %v2420_v27 }
 0x3ca   :  { %v1832_v29 = vmul.f32 1.442695, %v1818_v26  ;;  %v1800_v4 = vpop.f32.mrb[24].mxu1  ;;  %v2639_v60 = vpop.eup %2638  ;;  %2517 = vmatmul.mubr.msk.f32.gmra.mrb[28].mxu1 %vm1871_vm0, %v1847_v6 }
 0x3cb   :  { %v1801_v58 = vadd.f32 %v1800_v4, %v3341_v47  ;;  %v2502_v9 = vpop.f32.mrb[25].mxu1  ;;  %v2421_v12 = vadd.f32 -1.0, %v2639_v60 }
 0x3cc   :  { %2642 = vpow2.f32 %v1832_v29 }
 0x3cd   :  { %v1819_v7 = vmin.f32 %v1801_v58, 0.0  ;;  %v1848_v17 = vsel %vm1808_vm15, %v1591_v44, %v2421_v12  ;;  %vm1811_vm4 = vcmp.gt.f32.partialorder %v1801_v58, 0.0 }
 0x3ce   :  { %2519 = vmatprep.mubr.msk.f32.mxu1 %vm1871_vm0, %v1848_v17 }
 0x3cf   :  { %v1834_v36 = vmul.f32 1.442695, %v1819_v7 }
 0x3d1   :  { %2644 = vpow2.f32 %v1834_v36 }
 0x3d2   :  { %v2641_v42 = vpop.eup %2640 }
 0x3d3   :  { %v2422_v1 = vadd.f32 -1.0, %v2641_v42 }
 0x3d5   :  { %v1849_v48 = vsel %vm1809_vm1, %v1661_v61, %v2422_v1 }
 0x3d6   :  { %v2643_v10 = vpop.eup %2642  ;;  %2520 = vmatmul.mubr.msk.f32.gmra.mrb[30].mxu1 %vm1871_vm0, %v1849_v48 }
 0x3d7   :  { %v2423_v47 = vadd.f32 -1.0, %v2643_v10 }
 0x3d9   :  { %v1850_v34 = vsel %vm1810_vm3, %v1731_v22, %v2423_v47 }
 0x3da   :  { %2522 = vmatprep.mubr.msk.f32.mxu1 %vm1871_vm0, %v1850_v34 }
 0x3db   :  { %v2645_v31 = vpop.eup %2644 }
 0x3dc   :  { %v2424_v3 = vadd.f32 -1.0, %v2645_v31 }
 0x3de   :  { %v1851_v18 = vsel %vm1811_vm4, %v1801_v58, %v2424_v3 }
 0x3df   :  { %2523 = vmatmul.mubr.msk.f32.gmra.mrb[32].mxu1 %vm1871_vm0, %v1851_v18 }
 0x491   :  { %v2515_v50 = vpop.f32.mrb[26].mxu1 }
 0x492   :  { %v2008_v55 = vmul.f32 %v2515_v50, %v2005_v35  ;;  %v2100_v19 = vmul.f32 %v2515_v50, %v2097_v16  ;;  %v1965_v39 = vpop.f32.mrb[27].mxu1 }
 0x493   :  { %v2007_v62 = vmul.f32 %v2005_v35, %v1965_v39  ;;  %v2099_v21 = vmul.f32 %v2097_v16, %v1965_v39 }
 0x494   :  { %v2110_v11 = vsel %vm2015_vm6, %v2100_v19, 0.0  ;;  %v2019_v24 = vsel %vm2015_vm6, %v2008_v55, 0.0 }
 0x495   :  { %2111 = vadd.xlane.f32.xlu0 %v2110_v11  ;;  %2020 = vadd.xlane.f32.xlu1 %v2019_v24  ;;  %v2107_v63 = vsel %vm2015_vm6, %v2099_v21, 0.0  ;;  %v2016_v20 = vsel %vm2015_vm6, %v2007_v62, 0.0 }
 0x499   :  { %2108 = vadd.xlane.f32.xlu1 %v2107_v63  ;;  %2017 = vadd.xlane.f32.xlu0 %v2016_v20 }
 0x49d   :  { %v2518_v28 = vpop.f32.mrb[28].mxu1 }
 0x49e   :  { %v2102_v14 = vmul.f32 %v2518_v28, %v2097_v16  ;;  %v1975_v25 = vpop.f32.mrb[29].mxu1  ;;  %v2010_v30 = vmul.f32 %v2518_v28, %v2005_v35 }
 0x49f   :  { %v2101_v15 = vmul.f32 %v2097_v16, %v1975_v25  ;;  %v2009_v49 = vmul.f32 %v2005_v35, %v1975_v25 }
 0x4a0   :  { %v2116_v32 = vsel %vm2015_vm6, %v2102_v14, 0.0  ;;  %v2025_v33 = vsel %vm2015_vm6, %v2010_v30, 0.0 }
 0x4a1   :  { %2117 = vadd.xlane.f32.xlu1 %v2116_v32  ;;  %v2113_v13 = vsel %vm2015_vm6, %v2101_v15, 0.0  ;;  %v2022_v54 = vsel %vm2015_vm6, %v2009_v49, 0.0 }
 0x4a2   :  { %2114 = vadd.xlane.f32.xlu0 %v2113_v13 }
 0x4a5   :  { %2026 = vadd.xlane.f32.xlu1 %v2025_v33 }
 0x4a6   :  { %2023 = vadd.xlane.f32.xlu0 %v2022_v54 }
 0x4a9   :  { %v2521_v38 = vpop.f32.mrb[30].mxu1 }
 0x4aa   :  { %v2104_v43 = vmul.f32 %v2521_v38, %v2097_v16  ;;  %v1985_v44 = vpop.f32.mrb[31].mxu1  ;;  %v2012_v53 = vmul.f32 %v2521_v38, %v2005_v35 }
 0x4ab   :  { %v2103_v56 = vmul.f32 %v2097_v16, %v1985_v44  ;;  %v2011_v45 = vmul.f32 %v2005_v35, %v1985_v44 }
 0x4ac   :  { %v2122_v37 = vsel %vm2015_vm6, %v2104_v43, 0.0  ;;  %v2031_v57 = vsel %vm2015_vm6, %v2012_v53, 0.0 }
 0x4ad   :  { %2123 = vadd.xlane.f32.xlu1 %v2122_v37  ;;  %v2119_v51 = vsel %vm2015_vm6, %v2103_v56, 0.0  ;;  %v2028_v40 = vsel %vm2015_vm6, %v2011_v45, 0.0 }
 0x4ae   :  { %2120 = vadd.xlane.f32.xlu0 %v2119_v51 }
 0x4b1   :  { %2032 = vadd.xlane.f32.xlu1 %v2031_v57 }
 0x4b2   :  { %2029 = vadd.xlane.f32.xlu0 %v2028_v40  ;;  %v2524_v61 = vpop.f32.mrb[32].mxu1 }
 0x4b3   :  { %v2106_v0 = vmul.f32 %v2524_v61, %v2097_v16  ;;  %v1995_v59 = vpop.f32.mrb[33].mxu1  ;;  %v2014_v41 = vmul.f32 %v2524_v61, %v2005_v35 }
 0x4b4   :  { %v2105_v8 = vmul.f32 %v2097_v16, %v1995_v59  ;;  %v2013_v2 = vmul.f32 %v2005_v35, %v1995_v59 }
 0x4b5   :  { %v2128_v52 = vsel %vm2015_vm6, %v2106_v0, 0.0  ;;  %v2037_v5 = vsel %vm2015_vm6, %v2014_v41, 0.0 }
 0x4b6   :  { %2129 = vadd.xlane.f32.xlu1 %v2128_v52  ;;  %v2125_v22 = vsel %vm2015_vm6, %v2105_v8, 0.0  ;;  %v2034_v23 = vsel %vm2015_vm6, %v2013_v2, 0.0 }
 0x4b7   :  { %2126 = vadd.xlane.f32.xlu0 %v2125_v22 }
 0x4ba   :  { %2038 = vadd.xlane.f32.xlu1 %v2037_v5 }
 0x4bb   :  { %2035 = vadd.xlane.f32.xlu0 %v2034_v23 }
 0x522   :  { %v2112_v26 = vpop.xlane.xlu0 %2111  ;;  %v2021_v27 = vpop.xlane.xlu1 %2020 }
 0x523   :  { %v2137_v29 = vrot.slane %v2112_v26, 4  ;;  %v2046_v4 = vrot.slane %v2021_v27, 4 }
 0x525   :  { %v2138_v6 = vadd.f32 %v2137_v29, %v2112_v26  ;;  %v2047_v60 = vadd.f32 %v2046_v4, %v2021_v27 }
 0x526   :  { %v2109_v58 = vpop.xlane.xlu1 %2108  ;;  %v2018_v9 = vpop.xlane.xlu0 %2017 }
 0x527   :  { %v2139_v12 = vrot.slane %v2138_v6, 2  ;;  %v2048_v7 = vrot.slane %v2047_v60, 2  ;;  %v2131_v17 = vrot.slane %v2109_v58, 4  ;;  %v2040_v36 = vrot.slane %v2018_v9, 4 }
 0x529   :  { %v2140_v42 = vadd.f32 %v2139_v12, %v2138_v6  ;;  %v2049_v1 = vadd.f32 %v2048_v7, %v2047_v60  ;;  %v2132_v48 = vadd.f32 %v2131_v17, %v2109_v58  ;;  %v2041_v10 = vadd.f32 %v2040_v36, %v2018_v9 }
 0x52b   :  { %v2141_v47 = vrot.slane %v2140_v42, 1  ;;  %v2050_v34 = vrot.slane %v2049_v1, 1  ;;  %v2133_v31 = vrot.slane %v2132_v48, 2  ;;  %v2042_v3 = vrot.slane %v2041_v10, 2 }
 0x52d   :  { %v2051_v18 = vadd.f32 %v2050_v34, %v2049_v1  ;;  %v2134_v35 = vadd.f32 %v2133_v31, %v2132_v48  ;;  %v2043_v16 = vadd.f32 %v2042_v3, %v2041_v10  ;;  %v2142_v50 = vadd.f32 %v2141_v47, %v2140_v42 }
 0x52e   :  { %v2118_v55 = vpop.xlane.xlu1 %2117 }
 0x52f   :  { %v2135_v19 = vrot.slane %v2134_v35, 1  ;;  %v2044_v39 = vrot.slane %v2043_v16, 1  ;;  %v2149_v62 = vrot.slane %v2118_v55, 4  ;;  %v2115_v21 = vpop.xlane.xlu0 %2114  ;;  %v2089_v11 = vadd.f32 %v3346_v46, %v2051_v18 }
 0x530   :  { %v2143_v24 = vrot.slane %v2115_v21, 4  ;;  %v2180_v15 = vadd.f32 %v3346_v46, %v2142_v50 }
 0x531   :  { %v2136_v63 = vadd.f32 %v2135_v19, %v2134_v35  ;;  %v2045_v20 = vadd.f32 %v2044_v39, %v2043_v16  ;;  %v2150_v28 = vadd.f32 %v2149_v62, %v2118_v55  ;;  %2197 = vrot.lane.b32.xlu1 %v2089_v11, %s2696_s1 }
 0x532   :  { %v2144_v14 = vadd.f32 %v2143_v24, %v2115_v21  ;;  %v2027_v25 = vpop.xlane.xlu1 %2026  ;;  %v2228_v57 = vrot.slane %v2180_v15, 1 }
 0x533   :  { %v2151_v30 = vrot.slane %v2150_v28, 2  ;;  %v2058_v32 = vrot.slane %v2027_v25, 4  ;;  %v2024_v49 = vpop.xlane.xlu0 %2023  ;;  %v2088_v13 = vadd.f32 %v3346_v46, %v2045_v20  ;;  %v2179_v33 = vadd.f32 %v3346_v46, %v2136_v63 }
 0x534   :  { %v2145_v54 = vrot.slane %v2144_v14, 2  ;;  %v2052_v38 = vrot.slane %v2024_v49, 4 }
 0x535   :  { %v2152_v43 = vadd.f32 %v2151_v30, %v2150_v28  ;;  %v2059_v44 = vadd.f32 %v2058_v32, %v2027_v25  ;;  %2195 = vrot.lane.b32.xlu0 %v2088_v13, %s2696_s1  ;;  %v2227_v56 = vrot.slane %v2179_v33, 1 }
 0x536   :  { %v2146_v53 = vadd.f32 %v2145_v54, %v2144_v14  ;;  %v2053_v37 = vadd.f32 %v2052_v38, %v2024_v49 }
 0x537   :  { %v2153_v45 = vrot.slane %v2152_v43, 1  ;;  %v2060_v51 = vrot.slane %v2059_v44, 2  ;;  %2235 = vrot.lane.b32.xlu1 %v2227_v56, %s2697_s8 }
 0x538   :  { %v2147_v40 = vrot.slane %v2146_v53, 1  ;;  %v2054_v61 = vrot.slane %v2053_v37, 2 }
 0x539   :  { %v2061_v0 = vadd.f32 %v2060_v51, %v2059_v44  ;;  %2237 = vrot.lane.b32.xlu0 %v2228_v57, %s2697_s8  ;;  %v2154_v2 = vadd.f32 %v2153_v45, %v2152_v43 }
 0x53a   :  { %v2124_v59 = vpop.xlane.xlu1 %2123  ;;  %v2055_v8 = vadd.f32 %v2054_v61, %v2053_v37  ;;  %v2148_v23 = vadd.f32 %v2147_v40, %v2146_v53 }
 0x53b   :  { %v2161_v41 = vrot.slane %v2124_v59, 4  ;;  %v2121_v52 = vpop.xlane.xlu0 %2120  ;;  %v2062_v22 = vrot.slane %v2061_v0, 1  ;;  %v2182_v42 = vadd.f32 %v3346_v46, %v2154_v2 }
 0x53c   :  { %v2155_v5 = vrot.slane %v2121_v52, 4  ;;  %v2056_v26 = vrot.slane %v2055_v8, 1  ;;  %v2181_v47 = vadd.f32 %v3346_v46, %v2148_v23 }
 0x53d   :  { %v2162_v27 = vadd.f32 %v2161_v41, %v2124_v59  ;;  %v2063_v29 = vadd.f32 %v2062_v22, %v2061_v0  ;;  %v2230_v39 = vrot.slane %v2182_v42, 1 }
 0x53e   :  { %v2156_v4 = vadd.f32 %v2155_v5, %v2121_v52  ;;  %v2033_v6 = vpop.xlane.xlu1 %2032  ;;  %v2057_v60 = vadd.f32 %v2056_v26, %v2055_v8  ;;  %v2229_v11 = vrot.slane %v2181_v47, 1 }
 0x53f   :  { %v2163_v58 = vrot.slane %v2162_v27, 2  ;;  %v2070_v9 = vrot.slane %v2033_v6, 4  ;;  %v2030_v12 = vpop.xlane.xlu0 %2029  ;;  %v2091_v36 = vadd.f32 %v3346_v46, %v2063_v29 }
 0x540   :  { %v2157_v7 = vrot.slane %v2156_v4, 2  ;;  %v2064_v17 = vrot.slane %v2030_v12, 4  ;;  %v2090_v10 = vadd.f32 %v3346_v46, %v2057_v60 }
 0x541   :  { %v2164_v1 = vadd.f32 %v2163_v58, %v2162_v27  ;;  %v2071_v48 = vadd.f32 %v2070_v9, %v2033_v6  ;;  %2201 = vrot.lane.b32.xlu0 %v2091_v36, %s2696_s1 }
 0x542   :  { %v2158_v34 = vadd.f32 %v2157_v7, %v2156_v4  ;;  %v2065_v31 = vadd.f32 %v2064_v17, %v2030_v12  ;;  %2199 = vrot.lane.b32.xlu1 %v2090_v10, %s2696_s1 }
 0x543   :  { %v2165_v3 = vrot.slane %v2164_v1, 1  ;;  %v2072_v18 = vrot.slane %v2071_v48, 2  ;;  %v2130_v35 = vpop.xlane.xlu1 %2129 }
 0x544   :  { %v2159_v16 = vrot.slane %v2158_v34, 1  ;;  %v2066_v50 = vrot.slane %v2065_v31, 2  ;;  %v2173_v55 = vrot.slane %v2130_v35, 4  ;;  %v2127_v19 = vpop.xlane.xlu0 %2126 }
 0x545   :  { %v2073_v62 = vadd.f32 %v2072_v18, %v2071_v48  ;;  %v2167_v21 = vrot.slane %v2127_v19, 4  ;;  %2241 = vrot.lane.b32.xlu0 %v2230_v39, %s2697_s8  ;;  %v2166_v20 = vadd.f32 %v2165_v3, %v2164_v1 }
 0x546   :  { %v2067_v24 = vadd.f32 %v2066_v50, %v2065_v31  ;;  %v2174_v63 = vadd.f32 %v2173_v55, %v2130_v35  ;;  %2239 = vrot.lane.b32.xlu1 %v2229_v11, %s2697_s8  ;;  %v2160_v15 = vadd.f32 %v2159_v16, %v2158_v34 }
 0x547   :  { %v2074_v28 = vrot.slane %v2073_v62, 1  ;;  %v2168_v14 = vadd.f32 %v2167_v21, %v2127_v19  ;;  %v2039_v25 = vpop.xlane.xlu1 %2038  ;;  %v2184_v51 = vadd.f32 %v3346_v46, %v2166_v20 }
 0x548   :  { %v2068_v30 = vrot.slane %v2067_v24, 1  ;;  %v2175_v32 = vrot.slane %v2174_v63, 2  ;;  %v2082_v49 = vrot.slane %v2039_v25, 4  ;;  %v2036_v13 = vpop.xlane.xlu0 %2035  ;;  %v2183_v0 = vadd.f32 %v3346_v46, %v2160_v15 }
 0x549   :  { %v2075_v33 = vadd.f32 %v2074_v28, %v2073_v62  ;;  %v2169_v54 = vrot.slane %v2168_v14, 2  ;;  %v2076_v38 = vrot.slane %v2036_v13, 4  ;;  %v2232_v2 = vrot.slane %v2184_v51, 1 }
 0x54a   :  { %v2069_v43 = vadd.f32 %v2068_v30, %v2067_v24  ;;  %v2176_v44 = vadd.f32 %v2175_v32, %v2174_v63  ;;  %v2083_v56 = vadd.f32 %v2082_v49, %v2039_v25  ;;  %v2231_v23 = vrot.slane %v2183_v0, 1 }
 0x54b   :  { %v2170_v53 = vadd.f32 %v2169_v54, %v2168_v14  ;;  %v2077_v37 = vadd.f32 %v2076_v38, %v2036_v13  ;;  %v2093_v45 = vadd.f32 %v3346_v46, %v2075_v33 }
 0x54c   :  { %v2177_v57 = vrot.slane %v2176_v44, 1  ;;  %v2084_v40 = vrot.slane %v2083_v56, 2  ;;  %v2092_v61 = vadd.f32 %v3346_v46, %v2069_v43 }
 0x54d   :  { %v2171_v59 = vrot.slane %v2170_v53, 1  ;;  %v2078_v8 = vrot.slane %v2077_v37, 2  ;;  %2205 = vrot.lane.b32.xlu0 %v2093_v45, %s2696_s1 }
 0x54e   :  { %v2085_v41 = vadd.f32 %v2084_v40, %v2083_v56  ;;  %2203 = vrot.lane.b32.xlu1 %v2092_v61, %s2696_s1  ;;  %v2178_v22 = vadd.f32 %v2177_v57, %v2176_v44 }
 0x54f   :  { %v2079_v52 = vadd.f32 %v2078_v8, %v2077_v37  ;;  %v2172_v26 = vadd.f32 %v2171_v59, %v2170_v53 }
 0x550   :  { %v2086_v5 = vrot.slane %v2085_v41, 1  ;;  %v2186_v60 = vadd.f32 %v3346_v46, %v2178_v22 }
 0x551   :  { %v2080_v27 = vrot.slane %v2079_v52, 1  ;;  %2245 = vrot.lane.b32.xlu0 %v2232_v2, %s2697_s8  ;;  %v2185_v9 = vadd.f32 %v3346_v46, %v2172_v26 }
 0x552   :  { %v2087_v29 = vadd.f32 %v2086_v5, %v2085_v41  ;;  %2243 = vrot.lane.b32.xlu1 %v2231_v23, %s2697_s8  ;;  %v2234_v12 = vrot.slane %v2186_v60, 1 }
 0x553   :  { %v2081_v4 = vadd.f32 %v2080_v27, %v2079_v52  ;;  %v2233_v7 = vrot.slane %v2185_v9, 1 }
 0x554   :  { %v2095_v6 = vadd.f32 %v3346_v46, %v2087_v29 }
 0x555   :  { %v2094_v58 = vadd.f32 %v3346_v46, %v2081_v4 }
 0x556   :  { %2209 = vrot.lane.b32.xlu0 %v2095_v6, %s2696_s1 }
 0x557   :  { %2207 = vrot.lane.b32.xlu1 %v2094_v58, %s2696_s1 }
 0x55a   :  { %2249 = vrot.lane.b32.xlu0 %v2234_v12, %s2697_s8 }
 0x55b   :  { %2247 = vrot.lane.b32.xlu1 %v2233_v7, %s2697_s8 }
 0x5a3   :  { %v2198_v17 = vpop.permute.xlu1 %2197 }
 0x5a7   :  { %v2196_v36 = vpop.permute.xlu0 %2195 }
 0x5a9   :  { %v2236_v42 = vpop.permute.xlu1 %2235 }
 0x5aa   :  { %v2259_v1 = vsel %vm670_vm2, %v2196_v36, %v2236_v42 }
 0x5ab   :  { %v2238_v48 = vpop.permute.xlu0 %2237  ;;  %v2268_v10 = vsel %vm2267_vm7, %v2259_v1, -inf }
 0x5ac   :  { %2269 = vmax.xlane.f32.xlu1 %v2268_v10  ;;  %v2260_v46 = vsel %vm670_vm2, %v2198_v17, %v2238_v48 }
 0x5ad   :  { %v2271_v47 = vsel %vm2267_vm7, %v2260_v46, -inf }
 0x5ae   :  { %2272 = vmax.xlane.f32.xlu0 %v2271_v47 }
 0x5b3   :  { %v2202_v34 = vpop.permute.xlu0 %2201 }
 0x5b4   :  { %v2200_v31 = vpop.permute.xlu1 %2199 }
 0x5b7   :  { %v2242_v3 = vpop.permute.xlu0 %2241 }
 0x5b8   :  { %v2262_v18 = vsel %vm670_vm2, %v2202_v34, %v2242_v3  ;;  %v2240_v35 = vpop.permute.xlu1 %2239 }
 0x5b9   :  { %v2277_v16 = vsel %vm2267_vm7, %v2262_v18, -inf  ;;  %v2261_v50 = vsel %vm670_vm2, %v2200_v31, %v2240_v35 }
 0x5ba   :  { %2278 = vmax.xlane.f32.xlu1 %v2277_v16  ;;  %v2274_v55 = vsel %vm2267_vm7, %v2261_v50, -inf }
 0x5bb   :  { %2275 = vmax.xlane.f32.xlu0 %v2274_v55 }
 0x5bf   :  { %v2206_v19 = vpop.permute.xlu0 %2205 }
 0x5c0   :  { %v2204_v39 = vpop.permute.xlu1 %2203 }
 0x5c3   :  { %v2246_v62 = vpop.permute.xlu0 %2245 }
 0x5c4   :  { %v2264_v21 = vsel %vm670_vm2, %v2206_v19, %v2246_v62  ;;  %v2244_v11 = vpop.permute.xlu1 %2243 }
 0x5c5   :  { %v2283_v24 = vsel %vm2267_vm7, %v2264_v21, -inf  ;;  %v2263_v63 = vsel %vm670_vm2, %v2204_v39, %v2244_v11 }
 0x5c6   :  { %2284 = vmax.xlane.f32.xlu1 %v2283_v24  ;;  %v2280_v20 = vsel %vm2267_vm7, %v2263_v63, -inf }
 0x5c7   :  { %2281 = vmax.xlane.f32.xlu0 %v2280_v20 }
 0x5c8   :  { %v2210_v28 = vpop.permute.xlu0 %2209 }
 0x5c9   :  { %v2208_v14 = vpop.permute.xlu1 %2207 }
 0x5cc   :  { %v2250_v25 = vpop.permute.xlu0 %2249 }
 0x5cd   :  { %v2266_v15 = vsel %vm670_vm2, %v2210_v28, %v2250_v25  ;;  %v2248_v30 = vpop.permute.xlu1 %2247 }
 0x5ce   :  { %v2265_v32 = vsel %vm670_vm2, %v2208_v14, %v2248_v30  ;;  %v2289_v49 = vsel %vm2267_vm7, %v2266_v15, -inf }
 0x5cf   :  { %2290 = vmax.xlane.f32.xlu1 %v2289_v49  ;;  %v2286_v13 = vsel %vm2267_vm7, %v2265_v32, -inf }
 0x5d0   :  { %2287 = vmax.xlane.f32.xlu0 %v2286_v13 }
 0x639   :  { %v2270_v33 = vpop.xlane.xlu1 %2269 }
 0x63a   :  { %v3430_v54 = vsub.f32 %v2259_v1, %v2270_v33 }
 0x63b   :  { %v2273_v38 = vpop.xlane.xlu0 %2272 }
 0x63c   :  { %v2300_v43 = vmul.f32 1.442695, %v3430_v54  ;;  %v3433_v44 = vsub.f32 %v2260_v46, %v2273_v38 }
 0x63e   :  { %2646 = vpow2.f32 %v2300_v43  ;;  %v2302_v56 = vmul.f32 1.442695, %v3433_v44 }
 0x640   :  { %2648 = vpow2.f32 %v2302_v56 }
 0x647   :  { %v2279_v53 = vpop.xlane.xlu1 %2278 }
 0x648   :  { %v2647_v37 = vpop.eup %2646  ;;  %v3436_v45 = vsub.f32 %v2262_v18, %v2279_v53  ;;  %v2276_v51 = vpop.xlane.xlu0 %2275 }
 0x649   :  { %v3438_v57 = vsub.f32 %v2261_v50, %v2276_v51  ;;  %v2316_v40 = vsel %vm2267_vm7, %v2647_v37, 0.0 }
 0x64a   :  { %v2649_v61 = vpop.eup %2648  ;;  %v2306_v0 = vmul.f32 1.442695, %v3436_v45  ;;  %2317 = vadd.xlane.f32.xlu0 %v2316_v40 }
 0x64b   :  { %v2304_v59 = vmul.f32 1.442695, %v3438_v57  ;;  %v2319_v8 = vsel %vm2267_vm7, %v2649_v61, 0.0 }
 0x64c   :  { %2650 = vpow2.f32 %v2306_v0  ;;  %2320 = vadd.xlane.f32.xlu1 %v2319_v8 }
 0x64d   :  { %2652 = vpow2.f32 %v2304_v59 }
 0x653   :  { %v2285_v41 = vpop.xlane.xlu1 %2284 }
 0x654   :  { %v3444_v52 = vsub.f32 %v2264_v21, %v2285_v41  ;;  %v2282_v2 = vpop.xlane.xlu0 %2281 }
 0x655   :  { %v3446_v22 = vsub.f32 %v2263_v63, %v2282_v2 }
 0x656   :  { %v2310_v5 = vmul.f32 1.442695, %v3444_v52  ;;  %v2651_v23 = vpop.eup %2650 }
 0x657   :  { %v2308_v26 = vmul.f32 1.442695, %v3446_v22  ;;  %v2653_v27 = vpop.eup %2652  ;;  %v2325_v29 = vsel %vm2267_vm7, %v2651_v23, 0.0 }
 0x658   :  { %2654 = vpow2.f32 %v2310_v5  ;;  %2326 = vadd.xlane.f32.xlu1 %v2325_v29  ;;  %v2322_v4 = vsel %vm2267_vm7, %v2653_v27, 0.0 }
 0x659   :  { %2656 = vpow2.f32 %v2308_v26  ;;  %2323 = vadd.xlane.f32.xlu0 %v2322_v4 }
 0x65c   :  { %v2291_v6 = vpop.xlane.xlu1 %2290 }
 0x65d   :  { %v3452_v60 = vsub.f32 %v2266_v15, %v2291_v6  ;;  %v2288_v58 = vpop.xlane.xlu0 %2287 }
 0x65e   :  { %v3454_v9 = vsub.f32 %v2265_v32, %v2288_v58 }
 0x65f   :  { %v2314_v12 = vmul.f32 1.442695, %v3452_v60 }
 0x660   :  { %v2312_v7 = vmul.f32 1.442695, %v3454_v9 }
 0x661   :  { %2658 = vpow2.f32 %v2314_v12 }
 0x662   :  { %v2655_v17 = vpop.eup %2654  ;;  %2660 = vpow2.f32 %v2312_v7 }
 0x663   :  { %v2657_v36 = vpop.eup %2656  ;;  %v2331_v42 = vsel %vm2267_vm7, %v2655_v17, 0.0 }
 0x664   :  { %2332 = vadd.xlane.f32.xlu1 %v2331_v42  ;;  %v2328_v1 = vsel %vm2267_vm7, %v2657_v36, 0.0 }
 0x665   :  { %2329 = vadd.xlane.f32.xlu0 %v2328_v1 }
 0x66b   :  { %v2659_v48 = vpop.eup %2658 }
 0x66c   :  { %v2661_v10 = vpop.eup %2660  ;;  %v2337_v46 = vsel %vm2267_vm7, %v2659_v48, 0.0 }
 0x66d   :  { %2338 = vadd.xlane.f32.xlu1 %v2337_v46  ;;  %v2334_v47 = vsel %vm2267_vm7, %v2661_v10, 0.0 }
 0x66e   :  { %2335 = vadd.xlane.f32.xlu0 %v2334_v47 }
 0x6d7   :  { %v2318_v34 = vpop.xlane.xlu0 %2317 }
 0x6d8   :  { %2662 = vlog2.f32 %v2318_v34 }
 0x6d9   :  { %v2321_v31 = vpop.xlane.xlu1 %2320 }
 0x6da   :  { %2664 = vlog2.f32 %v2321_v31 }
 0x6e2   :  { %v2663_v3 = vpop.eup %2662 }
 0x6e3   :  { %v2341_v18 = vmul.f32 0.6931472, %v2663_v3 }
 0x6e4   :  { %v2665_v35 = vpop.eup %2664 }
 0x6e5   :  { %v2356_v16 = vsub.f32 %v3430_v54, %v2341_v18  ;;  %v2343_v50 = vmul.f32 0.6931472, %v2665_v35  ;;  %v2327_v55 = vpop.xlane.xlu1 %2326 }
 0x6e6   :  { %2666 = vlog2.f32 %v2327_v55  ;;  %v2324_v19 = vpop.xlane.xlu0 %2323 }
 0x6e7   :  { %2364 = vst.msk [vmem:[%s3505_s3] sm:$0x1] %vm2267_vm7, %v2356_v16  ;;  %v2357_v39 = vsub.f32 %v3433_v44, %v2343_v50  ;;  %2668 = vlog2.f32 %v2324_v19 }
 0x6e9   :  { %2365 = vst.msk [vmem:[%s3505_s3 + $0x1] sm:$0x1] %vm2267_vm7, %v2357_v39 }
 0x6f0   :  { %v2667_v62 = vpop.eup %2666 }
 0x6f1   :  { %v2333_v21 = vpop.xlane.xlu1 %2332  ;;  %v2669_v11 = vpop.eup %2668  ;;  %v2347_v24 = vmul.f32 0.6931472, %v2667_v62 }
 0x6f2   :  { %2670 = vlog2.f32 %v2333_v21  ;;  %v2330_v63 = vpop.xlane.xlu0 %2329  ;;  %v2345_v20 = vmul.f32 0.6931472, %v2669_v11 }
 0x6f3   :  { %2672 = vlog2.f32 %v2330_v63  ;;  %v2359_v28 = vsub.f32 %v3436_v45, %v2347_v24 }
 0x6f4   :  { %v2358_v14 = vsub.f32 %v3438_v57, %v2345_v20 }
 0x6f5   :  { %2367 = vst.msk [vmem:[%s3505_s3 + $0x3] sm:$0x1] %vm2267_vm7, %v2359_v28 }
 0x6f6   :  { %2366 = vst.msk [vmem:[%s3505_s3 + $0x2] sm:$0x1] %vm2267_vm7, %v2358_v14 }
 0x6fa   :  { %v2339_v25 = vpop.xlane.xlu1 %2338 }
 0x6fb   :  { %2674 = vlog2.f32 %v2339_v25  ;;  %v2336_v15 = vpop.xlane.xlu0 %2335 }
 0x6fc   :  { %v2671_v30 = vpop.eup %2670  ;;  %2676 = vlog2.f32 %v2336_v15 }
 0x6fd   :  { %v2673_v32 = vpop.eup %2672  ;;  %v2351_v49 = vmul.f32 0.6931472, %v2671_v30 }
 0x6fe   :  { %v2349_v13 = vmul.f32 0.6931472, %v2673_v32 }
 0x6ff   :  { %v2361_v33 = vsub.f32 %v3444_v52, %v2351_v49 }
 0x700   :  { %v2360_v54 = vsub.f32 %v3446_v22, %v2349_v13 }
 0x701   :  { %2369 = vst.msk [vmem:[%s3505_s3 + $0x5] sm:$0x1] %vm2267_vm7, %v2361_v33 }
 0x702   :  { %2368 = vst.msk [vmem:[%s3505_s3 + $0x4] sm:$0x1] %vm2267_vm7, %v2360_v54 }
 0x705   :  { %v2675_v38 = vpop.eup %2674 }
 0x706   :  { %v2677_v43 = vpop.eup %2676  ;;  %v2355_v44 = vmul.f32 0.6931472, %v2675_v38 }
 0x707   :  { %v2353_v56 = vmul.f32 0.6931472, %v2677_v43 }
 0x708   :  { %v2363_v53 = vsub.f32 %v3452_v60, %v2355_v44 }
 0x709   :  { %v2362_v37 = vsub.f32 %v3454_v9, %v2353_v56 }
 0x70a   :  { %2371 = vst.msk [vmem:[%s3505_s3 + $0x7] sm:$0x1] %vm2267_vm7, %v2363_v53 }
 0x70b   :  { %2370 = vst.msk [vmem:[%s3505_s3 + $0x6] sm:$0x1] %vm2267_vm7, %v2362_v37 }

</bundles_post_ra>
